<compile_context>
chip_gen: v7x
topology: tpu7x:2x2x1
jax: 0.10.0
libtpu: 0.0.40
codegen_flags: <defaults>
</compile_context>

<pallas_src>
from functools import partial

import jax
import jax.numpy as jnp
from jax.experimental import pallas as pl
from jax.experimental.pallas import tpu as pltpu

EMBED_DIM = 32
NUM_HEADS = 2
HIDDEN_DIM = 64
NUM_LAYERS = 2
NUM_CLASSES = 4
MAX_LEN = 16
VOCAB_SIZE = 50
LN_EPS = 1e-5
LANES = 128
NEG_BIG = -1e9


def _vmem_spec():
    return pl.BlockSpec(memory_space=pltpu.MemorySpace.VMEM)


def _round8(n):
    return ((n + 7) // 8) * 8


def make_slab_layout(batch_size, seq_len):
    """Row offsets (all multiples of 8) of every constant inside the packed slab."""
    R = batch_size * seq_len
    offs, row = {}, 0

    def alloc(name, rows):
        nonlocal row
        offs[name] = row
        row += _round8(rows)

    alloc('emb', VOCAB_SIZE)      # (V, E)
    alloc('pos', R)               # (R, E)  pos embedding repeated per row
    alloc('mask', R)              # (R, R)  block-diagonal additive mask
    alloc('pool', batch_size)     # (B, R)  mean-pool matrix (1/S folded in)
    for l in range(NUM_LAYERS):
        alloc(f'wqkv{l}', EMBED_DIM)   # (E, 3E)
        alloc(f'wo{l}', EMBED_DIM)     # (E, E)
        alloc(f'w1{l}', EMBED_DIM)     # (E, H)
        alloc(f'w2{l}', HIDDEN_DIM)    # (H, E)
        alloc(f'vec{l}', 8)            # (8, 128) packed biases / LN vectors
    alloc('wfc', EMBED_DIM)       # (E, C)
    alloc('bfc', 1)               # (1, C)
    return offs, row


def fused_forward_kernel(tok_ref, w_ref, o_ref, *, offs, num_heads, num_layers):
    """Whole TransformerClassifier forward on one token block.

    tok_ref : (R, 1) int32   row r = (seq pos r // B, batch col r % B)
    w_ref   : (rows, 128) f32 packed constant slab (see make_slab_layout)
    o_ref   : (B, C) f32 logits
    """
    R = tok_ref.shape[0]
    B = o_ref.shape[0]
    E, H, V, C = EMBED_DIM, HIDDEN_DIM, VOCAB_SIZE, NUM_CLASSES
    hd = E // num_heads

    # ---- embedding lookup as a 2D one-hot matmul (whole 50x32 table lives in VMEM) ----
    tok = tok_ref[...]                                                      # (R, 1)
    onehot = (tok == jax.lax.broadcasted_iota(jnp.int32, (R, V), 1)).astype(jnp.float32)
    emb = w_ref[offs['emb']:offs['emb'] + V, :E]                            # (V, E)
    pos = w_ref[offs['pos']:offs['pos'] + R, :E]                            # (R, E)
    x = jnp.dot(onehot, emb, preferred_element_type=jnp.float32) + pos      # (R, E)

    # precomputed block-diagonal additive mask (0 on-block, -1e9 off-block)
    mask = w_ref[offs['mask']:offs['mask'] + R, :R]                         # (R, R)

    def layer_norm(z, gamma, beta):
        mu = jnp.mean(z, axis=-1, keepdims=True)
        var = jnp.mean(jnp.square(z - mu), axis=-1, keepdims=True)
        return (z - mu) * jax.lax.rsqrt(var + LN_EPS) * gamma + beta

    for l in range(num_layers):                                             # static unroll
        o_wqkv, o_wo = offs[f'wqkv{l}'], offs[f'wo{l}']
        o_w1, o_w2 = offs[f'w1{l}'], offs[f'w2{l}']
        wqkv = w_ref[o_wqkv:o_wqkv + E, :3 * E]                             # (E, 3E)
        w1 = w_ref[o_w1:o_w1 + E, :H]                                       # (E, H)
        w2 = w_ref[o_w2:o_w2 + H, :E]                                       # (H, E)
        vec = w_ref[offs[f'vec{l}']:offs[f'vec{l}'] + 8, :]                 # (8, 128)
        bqkv = vec[0:1, :3 * E]
        bo, b2 = vec[1:2, :E], vec[3:4, :E]
        b1 = vec[2:3, :H]
        g1, be1 = vec[4:5, :E], vec[5:6, :E]
        g2, be2 = vec[6:7, :E], vec[7:8, :E]

        # ---- self attention, fully 2D; 1/sqrt(hd) already folded into Wq / bq ----
        qkv = jnp.dot(x, wqkv, preferred_element_type=jnp.float32) + bqkv   # (R, 3E)

        attn = bo                                                           # (1, E) broadcast
        for h in range(num_heads):
            qh = qkv[:, h * hd:(h + 1) * hd]                                # (R, hd)
            kh = qkv[:, E + h * hd:E + (h + 1) * hd]                        # (R, hd)
            vh = qkv[:, 2 * E + h * hd:2 * E + (h + 1) * hd]                # (R, hd)
            # scores over ALL R rows with block-diagonal mask == per-position attention
            s = jax.lax.dot_general(qh, kh, (((1,), (1,)), ((), ())),
                                    preferred_element_type=jnp.float32)     # (R, R)
            s = s + mask
            s = s - jnp.max(s, axis=-1, keepdims=True)
            p = jnp.exp(s)
            p = p * pl.reciprocal(jnp.sum(p, axis=-1, keepdims=True), approx=True)
            ctx = jnp.dot(p, vh, preferred_element_type=jnp.float32)        # (R, hd)
            # concat_h(ctx_h) @ Wo  ==  sum_h ctx_h @ Wo[h*hd:(h+1)*hd, :]
            wo_h = w_ref[o_wo + h * hd:o_wo + (h + 1) * hd, :E]             # (hd, E)
            attn = attn + jnp.dot(ctx, wo_h, preferred_element_type=jnp.float32)

        x1 = layer_norm(x + attn, g1, be1)

        # ---- feed forward (ReLU) ----
        hh = jnp.maximum(jnp.dot(x1, w1, preferred_element_type=jnp.float32) + b1, 0.0)
        ff = jnp.dot(hh, w2, preferred_element_type=jnp.float32) + b2
        x = layer_norm(x1 + ff, g2, be2)

    # ---- mean over the S sequence rows per batch column (1/S folded in), then FC ----
    pool = w_ref[offs['pool']:offs['pool'] + B, :R]                         # (B, R)
    pooled = jnp.dot(pool, x, preferred_element_type=jnp.float32)           # (B, E)
    wfc = w_ref[offs['wfc']:offs['wfc'] + E, :C]                            # (E, C)
    bfc = w_ref[offs['bfc']:offs['bfc'] + 1, :C]                            # (1, C)
    o_ref[...] = jnp.dot(pooled, wfc, preferred_element_type=jnp.float32) + bfc


def prepare_kernel_params(params, batch_size, seq_len):
    """One-time repack of PyTorch-layout params into a single lane-dense constant slab."""
    E, H = EMBED_DIM, HIDDEN_DIM
    hd = E // NUM_HEADS
    B, S = batch_size, seq_len
    R = B * S
    offs, total_rows = make_slab_layout(B, S)
    slab = jnp.zeros((total_rows, LANES), jnp.float32)

    def put(name, arr):
        nonlocal slab
        arr = jnp.asarray(arr, jnp.float32)
        r, c = arr.shape
        slab = slab.at[offs[name]:offs[name] + r, :c].set(arr)

    put('emb', params['embedding'])                                   # (V, E)

    rgrid = jnp.arange(R)
    put('pos', params['pos_embedding'][rgrid // B])                   # (R, E) row r -> pos r//B

    grp = rgrid // B                                                  # sequence position of row r
    put('mask', jnp.where(grp[:, None] == grp[None, :], 0.0, NEG_BIG))  # (R, R)

    pool = ((rgrid[None, :] % B) == jnp.arange(B)[:, None]).astype(jnp.float32) / float(S)
    put('pool', pool)                                                 # (B, R)

    qscale = jnp.concatenate([jnp.full((E,), 1.0 / float(hd) ** 0.5, jnp.float32),
                              jnp.ones((2 * E,), jnp.float32)])
    for l, p in enumerate(params['layers']):
        put(f'wqkv{l}', p['wqkv'].T * qscale[None, :])                # (E, 3E), Q cols pre-scaled
        put(f'wo{l}', p['wo'].T)                                      # (E, E)
        put(f'w1{l}', p['w1'].T)                                      # (E, H)
        put(f'w2{l}', p['w2'].T)                                      # (H, E)
        vec = jnp.zeros((8, LANES), jnp.float32)
        vec = vec.at[0, :3 * E].set(p['bqkv'][0] * qscale)
        vec = vec.at[1, :E].set(p['bo'][0])
        vec = vec.at[2, :H].set(p['b1'][0])
        vec = vec.at[3, :E].set(p['b2'][0])
        vec = vec.at[4, :E].set(p['g1'][0])
        vec = vec.at[5, :E].set(p['be1'][0])
        vec = vec.at[6, :E].set(p['g2'][0])
        vec = vec.at[7, :E].set(p['be2'][0])
        put(f'vec{l}', vec)
    put('wfc', params['fc_w'].T)                                      # (E, C)
    put('bfc', params['fc_b'])                                        # (1, C)
    return dict(slab=slab, offs=offs, B=B, S=S)


def transformer_classifier_forward(tokens, kparams):
    B, S = tokens.shape
    R = B * S
    # row r = (seq pos r // B, batch col r % B); matches pos/mask/pool packing
    tok = jnp.transpose(tokens).astype(jnp.int32).reshape(R, 1)
    kern = partial(fused_forward_kernel, offs=kparams['offs'],
                   num_heads=NUM_HEADS, num_layers=NUM_LAYERS)
    return pl.pallas_call(
        kern,
        out_shape=jax.ShapeDtypeStruct((B, NUM_CLASSES), jnp.float32),
        in_specs=[_vmem_spec(), _vmem_spec()],
        out_specs=_vmem_spec(),
    )(tok, kparams['slab'])


def init_params(key):
    E, H, C, V, M, NL = EMBED_DIM, HIDDEN_DIM, NUM_CLASSES, VOCAB_SIZE, MAX_LEN, NUM_LAYERS
    keys = jax.random.split(key, 4 + NL)

    def w(k, shape, scale=0.02):
        return (scale * jax.random.normal(k, shape)).astype(jnp.float32)

    emb = w(keys[0], (V, E)).at[0].set(0.0)               # padding_idx=0 row zeroed
    pos = w(keys[1], (M, E))
    fc_w = w(keys[2], (C, E))
    fc_b = jnp.zeros((1, C), jnp.float32)
    layers = []
    for l in range(NL):
        lk = jax.random.split(keys[4 + l], 4)
        layers.append(dict(
            wqkv=w(lk[0], (3 * E, E)), bqkv=jnp.zeros((1, 3 * E), jnp.float32),
            wo=w(lk[1], (E, E)),       bo=jnp.zeros((1, E), jnp.float32),
            w1=w(lk[2], (H, E)),       b1=jnp.zeros((1, H), jnp.float32),
            w2=w(lk[3], (E, H)),       b2=jnp.zeros((1, E), jnp.float32),
            g1=jnp.ones((1, E), jnp.float32), be1=jnp.zeros((1, E), jnp.float32),
            g2=jnp.ones((1, E), jnp.float32), be2=jnp.zeros((1, E), jnp.float32),
        ))
    return dict(embedding=emb, pos_embedding=pos, fc_w=fc_w, fc_b=fc_b, layers=layers)


def reference_forward(tokens, params):
    """Pure-JAX reference mirroring the PyTorch forward (eval mode)."""
    B, S = tokens.shape
    x = params['embedding'][tokens] + params['pos_embedding'][:S][None]
    x = jnp.transpose(x, (1, 0, 2))
    for p in params['layers']:
        N, L, E = x.shape
        hd = E // NUM_HEADS
        qkv = x @ p['wqkv'].T + p['bqkv'][0]
        q, k, v = qkv[..., :E], qkv[..., E:2 * E], qkv[..., 2 * E:]
        ctxs = []
        for h in range(NUM_HEADS):
            sl = slice(h * hd, (h + 1) * hd)
            s = jnp.einsum('nld,nmd->nlm', q[..., sl], k[..., sl]) / float(hd) ** 0.5
            a = jax.nn.softmax(s, axis=-1)
            ctxs.append(jnp.einsum('nlm,nmd->nld', a, v[..., sl]))
        ctx = jnp.concatenate(ctxs, axis=-1)
        ao = ctx @ p['wo'].T + p['bo'][0]

        def ln(z, g, b):
            mu = z.mean(-1, keepdims=True)
            var = ((z - mu) ** 2).mean(-1, keepdims=True)
            return (z - mu) * jax.lax.rsqrt(var + LN_EPS) * g[0] + b[0]

        x1 = ln(x + ao, p['g1'], p['be1'])
        ff = jnp.maximum(x1 @ p['w1'].T + p['b1'][0], 0.0) @ p['w2'].T + p['b2'][0]
        x = ln(x1 + ff, p['g2'], p['be2'])
    pooled = x.mean(0)
    return pooled @ params['fc_w'].T + params['fc_b'][0]


if __name__ == "__main__":
    key = jax.random.PRNGKey(0)
    pkey, tkey = jax.random.split(key)
    params = init_params(pkey)

    B, S = 2, 8
    kparams = prepare_kernel_params(params, B, S)   # one-time constant repack (not per-call)

    tokens = jax.random.randint(tkey, (B, S), 0, VOCAB_SIZE, dtype=jnp.int32)

    out = transformer_classifier_forward(tokens, kparams)
    out = jax.block_until_ready(out)

    ref = reference_forward(tokens, params)
    assert out.shape == (B, NUM_CLASSES)
    if not jnp.allclose(out, ref, atol=1e-2, rtol=1e-2):
        raise AssertionError("Pallas output mismatch vs JAX reference")
    print("KERNEL_OK")
</pallas_src>

<mosaic_0001>
module attributes {stable_mosaic.version = 11 : i64} {
  func.func @fused_forward_kernel(%arg0: memref<16x1xi32, #tpu.memory_space<vmem>>, %arg1: memref<472x128xf32, #tpu.memory_space<vmem>>, %arg2: memref<2x4xf32, #tpu.memory_space<vmem>>) attributes {dimension_semantics = [], scalar_prefetch = 0 : i64, scratch_operands = 0 : i64, tpu.core_type = #tpu.core_type<tc>} {
    %c0 = arith.constant 0 : index
    %c0_0 = arith.constant 0 : index
    %0 = vector.load %arg0[%c0, %c0_0] : memref<16x1xi32, #tpu.memory_space<vmem>>, vector<16x1xi32>
    %1 = tpu.iota {dimensions = array<i32: 1>} : vector<16x50xi32>
    %2 = vector.broadcast %0 : vector<16x1xi32> to vector<16x50xi32>
    %3 = arith.cmpi eq, %2, %1 : vector<16x50xi32>
    %4 = arith.extui %3 : vector<16x50xi1> to vector<16x50xi32>
    %5 = arith.sitofp %4 : vector<16x50xi32> to vector<16x50xf32>
    %c0_1 = arith.constant 0 : index
    %c0_2 = arith.constant 0 : index
    %6 = vector.load %arg1[%c0_1, %c0_2] : memref<472x128xf32, #tpu.memory_space<vmem>>, vector<50x32xf32>
    %c56 = arith.constant 56 : index
    %c0_3 = arith.constant 0 : index
    %7 = vector.load %arg1[%c56, %c0_3] : memref<472x128xf32, #tpu.memory_space<vmem>>, vector<16x32xf32>
    %cst = arith.constant dense<0.000000e+00> : vector<16x32xf32>
    %8 = tpu.matmul %5, %6, %cst {dimension_numbers = #tpu.dot_dimension_numbers<[1], [0], [0], [1], [0, 0, 1, 1], [], []>} : vector<16x50xf32>, vector<50x32xf32>, vector<16x32xf32> -> vector<16x32xf32>
    %9 = arith.addf %8, %7 : vector<16x32xf32>
    %c72 = arith.constant 72 : index
    %c0_4 = arith.constant 0 : index
    %10 = vector.load %arg1[%c72, %c0_4] : memref<472x128xf32, #tpu.memory_space<vmem>>, vector<16x16xf32>
    %c96 = arith.constant 96 : index
    %c0_5 = arith.constant 0 : index
    %11 = vector.load %arg1[%c96, %c0_5] : memref<472x128xf32, #tpu.memory_space<vmem>>, vector<32x96xf32>
    %c160 = arith.constant 160 : index
    %c0_6 = arith.constant 0 : index
    %12 = vector.load %arg1[%c160, %c0_6] : memref<472x128xf32, #tpu.memory_space<vmem>>, vector<32x64xf32>
    %c192 = arith.constant 192 : index
    %c0_7 = arith.constant 0 : index
    %13 = vector.load %arg1[%c192, %c0_7] : memref<472x128xf32, #tpu.memory_space<vmem>>, vector<64x32xf32>
    %c256 = arith.constant 256 : index
    %c0_8 = arith.constant 0 : index
    %14 = vector.load %arg1[%c256, %c0_8] : memref<472x128xf32, #tpu.memory_space<vmem>>, vector<8x128xf32>
    %15 = vector.extract_strided_slice %14 {offsets = [0, 0], sizes = [1, 96], strides = [1, 1]} : vector<8x128xf32> to vector<1x96xf32>
    %16 = vector.extract_strided_slice %14 {offsets = [1, 0], sizes = [1, 32], strides = [1, 1]} : vector<8x128xf32> to vector<1x32xf32>
    %17 = vector.extract_strided_slice %14 {offsets = [3, 0], sizes = [1, 32], strides = [1, 1]} : vector<8x128xf32> to vector<1x32xf32>
    %18 = vector.extract_strided_slice %14 {offsets = [2, 0], sizes = [1, 64], strides = [1, 1]} : vector<8x128xf32> to vector<1x64xf32>
    %19 = vector.extract_strided_slice %14 {offsets = [4, 0], sizes = [1, 32], strides = [1, 1]} : vector<8x128xf32> to vector<1x32xf32>
    %20 = vector.extract_strided_slice %14 {offsets = [5, 0], sizes = [1, 32], strides = [1, 1]} : vector<8x128xf32> to vector<1x32xf32>
    %21 = vector.extract_strided_slice %14 {offsets = [6, 0], sizes = [1, 32], strides = [1, 1]} : vector<8x128xf32> to vector<1x32xf32>
    %22 = vector.extract_strided_slice %14 {offsets = [7, 0], sizes = [1, 32], strides = [1, 1]} : vector<8x128xf32> to vector<1x32xf32>
    %cst_9 = arith.constant dense<0.000000e+00> : vector<16x96xf32>
    %23 = tpu.matmul %9, %11, %cst_9 {dimension_numbers = #tpu.dot_dimension_numbers<[1], [0], [0], [1], [0, 0, 1, 1], [], []>} : vector<16x32xf32>, vector<32x96xf32>, vector<16x96xf32> -> vector<16x96xf32>
    %24 = vector.broadcast %15 : vector<1x96xf32> to vector<16x96xf32>
    %25 = arith.addf %23, %24 : vector<16x96xf32>
    %26 = vector.extract_strided_slice %25 {offsets = [0, 0], sizes = [16, 16], strides = [1, 1]} : vector<16x96xf32> to vector<16x16xf32>
    %27 = vector.extract_strided_slice %25 {offsets = [0, 32], sizes = [16, 16], strides = [1, 1]} : vector<16x96xf32> to vector<16x16xf32>
    %28 = vector.extract_strided_slice %25 {offsets = [0, 64], sizes = [16, 16], strides = [1, 1]} : vector<16x96xf32> to vector<16x16xf32>
    %cst_10 = arith.constant dense<0.000000e+00> : vector<16x16xf32>
    %29 = tpu.matmul %26, %27, %cst_10 {dimension_numbers = #tpu.dot_dimension_numbers<[1], [1], [0], [0], [0, 0, 1, 0], [], []>} : vector<16x16xf32>, vector<16x16xf32>, vector<16x16xf32> -> vector<16x16xf32>
    %30 = arith.addf %29, %10 : vector<16x16xf32>
    %cst_11 = arith.constant dense<0xFF800000> : vector<16xf32>
    %31 = vector.multi_reduction <maximumf>, %30, %cst_11 [1] : vector<16x16xf32> to vector<16xf32>
    %32 = vector.shape_cast %31 : vector<16xf32> to vector<16x1xf32>
    %33 = vector.broadcast %32 : vector<16x1xf32> to vector<16x16xf32>
    %34 = arith.subf %30, %33 : vector<16x16xf32>
    %35 = math.exp %34 : vector<16x16xf32>
    %cst_12 = arith.constant dense<0.000000e+00> : vector<16xf32>
    %36 = vector.multi_reduction <add>, %35, %cst_12 [1] : vector<16x16xf32> to vector<16xf32>
    %37 = vector.shape_cast %36 : vector<16xf32> to vector<16x1xf32>
    %38 = tpu.reciprocal %37 {approx = true} : vector<16x1xf32> -> vector<16x1xf32>
    %39 = vector.broadcast %38 : vector<16x1xf32> to vector<16x16xf32>
    %40 = arith.mulf %35, %39 : vector<16x16xf32>
    %cst_13 = arith.constant dense<0.000000e+00> : vector<16x16xf32>
    %41 = tpu.matmul %40, %28, %cst_13 {dimension_numbers = #tpu.dot_dimension_numbers<[1], [0], [0], [1], [0, 0, 1, 1], [], []>} : vector<16x16xf32>, vector<16x16xf32>, vector<16x16xf32> -> vector<16x16xf32>
    %c128 = arith.constant 128 : index
    %c0_14 = arith.constant 0 : index
    %42 = vector.load %arg1[%c128, %c0_14] : memref<472x128xf32, #tpu.memory_space<vmem>>, vector<16x32xf32>
    %cst_15 = arith.constant dense<0.000000e+00> : vector<16x32xf32>
    %43 = tpu.matmul %41, %42, %cst_15 {dimension_numbers = #tpu.dot_dimension_numbers<[1], [0], [0], [1], [0, 0, 1, 1], [], []>} : vector<16x16xf32>, vector<16x32xf32>, vector<16x32xf32> -> vector<16x32xf32>
    %44 = vector.broadcast %16 : vector<1x32xf32> to vector<16x32xf32>
    %45 = arith.addf %44, %43 : vector<16x32xf32>
    %46 = vector.extract_strided_slice %25 {offsets = [0, 16], sizes = [16, 16], strides = [1, 1]} : vector<16x96xf32> to vector<16x16xf32>
    %47 = vector.extract_strided_slice %25 {offsets = [0, 48], sizes = [16, 16], strides = [1, 1]} : vector<16x96xf32> to vector<16x16xf32>
    %48 = vector.extract_strided_slice %25 {offsets = [0, 80], sizes = [16, 16], strides = [1, 1]} : vector<16x96xf32> to vector<16x16xf32>
    %cst_16 = arith.constant dense<0.000000e+00> : vector<16x16xf32>
    %49 = tpu.matmul %46, %47, %cst_16 {dimension_numbers = #tpu.dot_dimension_numbers<[1], [1], [0], [0], [0, 0, 1, 0], [], []>} : vector<16x16xf32>, vector<16x16xf32>, vector<16x16xf32> -> vector<16x16xf32>
    %50 = arith.addf %49, %10 : vector<16x16xf32>
    %cst_17 = arith.constant dense<0xFF800000> : vector<16xf32>
    %51 = vector.multi_reduction <maximumf>, %50, %cst_17 [1] : vector<16x16xf32> to vector<16xf32>
    %52 = vector.shape_cast %51 : vector<16xf32> to vector<16x1xf32>
    %53 = vector.broadcast %52 : vector<16x1xf32> to vector<16x16xf32>
    %54 = arith.subf %50, %53 : vector<16x16xf32>
    %55 = math.exp %54 : vector<16x16xf32>
    %cst_18 = arith.constant dense<0.000000e+00> : vector<16xf32>
    %56 = vector.multi_reduction <add>, %55, %cst_18 [1] : vector<16x16xf32> to vector<16xf32>
    %57 = vector.shape_cast %56 : vector<16xf32> to vector<16x1xf32>
    %58 = tpu.reciprocal %57 {approx = true} : vector<16x1xf32> -> vector<16x1xf32>
    %59 = vector.broadcast %58 : vector<16x1xf32> to vector<16x16xf32>
    %60 = arith.mulf %55, %59 : vector<16x16xf32>
    %cst_19 = arith.constant dense<0.000000e+00> : vector<16x16xf32>
    %61 = tpu.matmul %60, %48, %cst_19 {dimension_numbers = #tpu.dot_dimension_numbers<[1], [0], [0], [1], [0, 0, 1, 1], [], []>} : vector<16x16xf32>, vector<16x16xf32>, vector<16x16xf32> -> vector<16x16xf32>
    %c144 = arith.constant 144 : index
    %c0_20 = arith.constant 0 : index
    %62 = vector.load %arg1[%c144, %c0_20] : memref<472x128xf32, #tpu.memory_space<vmem>>, vector<16x32xf32>
    %cst_21 = arith.constant dense<0.000000e+00> : vector<16x32xf32>
    %63 = tpu.matmul %61, %62, %cst_21 {dimension_numbers = #tpu.dot_dimension_numbers<[1], [0], [0], [1], [0, 0, 1, 1], [], []>} : vector<16x16xf32>, vector<16x32xf32>, vector<16x32xf32> -> vector<16x32xf32>
    %64 = arith.addf %45, %63 : vector<16x32xf32>
    %65 = arith.addf %9, %64 : vector<16x32xf32>
    %cst_22 = arith.constant dense<0.000000e+00> : vector<16xf32>
    %66 = vector.multi_reduction <add>, %65, %cst_22 [1] : vector<16x32xf32> to vector<16xf32>
    %67 = vector.shape_cast %66 : vector<16xf32> to vector<16x1xf32>
    %cst_23 = arith.constant 3.200000e+01 : f32
    %68 = vector.broadcast %cst_23 : f32 to vector<16x1xf32>
    %69 = arith.divf %67, %68 : vector<16x1xf32>
    %70 = vector.broadcast %69 : vector<16x1xf32> to vector<16x32xf32>
    %71 = arith.subf %65, %70 : vector<16x32xf32>
    %72 = arith.mulf %71, %71 : vector<16x32xf32>
    %cst_24 = arith.constant dense<0.000000e+00> : vector<16xf32>
    %73 = vector.multi_reduction <add>, %72, %cst_24 [1] : vector<16x32xf32> to vector<16xf32>
    %74 = vector.shape_cast %73 : vector<16xf32> to vector<16x1xf32>
    %cst_25 = arith.constant 3.200000e+01 : f32
    %75 = vector.broadcast %cst_25 : f32 to vector<16x1xf32>
    %76 = arith.divf %74, %75 : vector<16x1xf32>
    %77 = vector.broadcast %69 : vector<16x1xf32> to vector<16x32xf32>
    %78 = arith.subf %65, %77 : vector<16x32xf32>
    %cst_26 = arith.constant 9.99999974E-6 : f32
    %79 = vector.broadcast %cst_26 : f32 to vector<16x1xf32>
    %80 = arith.addf %76, %79 : vector<16x1xf32>
    %81 = math.rsqrt %80 : vector<16x1xf32>
    %82 = vector.broadcast %81 : vector<16x1xf32> to vector<16x32xf32>
    %83 = arith.mulf %78, %82 : vector<16x32xf32>
    %84 = vector.broadcast %19 : vector<1x32xf32> to vector<16x32xf32>
    %85 = arith.mulf %83, %84 : vector<16x32xf32>
    %86 = vector.broadcast %20 : vector<1x32xf32> to vector<16x32xf32>
    %87 = arith.addf %85, %86 : vector<16x32xf32>
    %cst_27 = arith.constant dense<0.000000e+00> : vector<16x64xf32>
    %88 = tpu.matmul %87, %12, %cst_27 {dimension_numbers = #tpu.dot_dimension_numbers<[1], [0], [0], [1], [0, 0, 1, 1], [], []>} : vector<16x32xf32>, vector<32x64xf32>, vector<16x64xf32> -> vector<16x64xf32>
    %89 = vector.broadcast %18 : vector<1x64xf32> to vector<16x64xf32>
    %90 = arith.addf %88, %89 : vector<16x64xf32>
    %cst_28 = arith.constant 0.000000e+00 : f32
    %91 = vector.broadcast %cst_28 : f32 to vector<16x64xf32>
    %92 = arith.maximumf %90, %91 : vector<16x64xf32>
    %cst_29 = arith.constant dense<0.000000e+00> : vector<16x32xf32>
    %93 = tpu.matmul %92, %13, %cst_29 {dimension_numbers = #tpu.dot_dimension_numbers<[1], [0], [0], [1], [0, 0, 1, 1], [], []>} : vector<16x64xf32>, vector<64x32xf32>, vector<16x32xf32> -> vector<16x32xf32>
    %94 = vector.broadcast %17 : vector<1x32xf32> to vector<16x32xf32>
    %95 = arith.addf %93, %94 : vector<16x32xf32>
    %96 = arith.addf %87, %95 : vector<16x32xf32>
    %cst_30 = arith.constant dense<0.000000e+00> : vector<16xf32>
    %97 = vector.multi_reduction <add>, %96, %cst_30 [1] : vector<16x32xf32> to vector<16xf32>
    %98 = vector.shape_cast %97 : vector<16xf32> to vector<16x1xf32>
    %cst_31 = arith.constant 3.200000e+01 : f32
    %99 = vector.broadcast %cst_31 : f32 to vector<16x1xf32>
    %100 = arith.divf %98, %99 : vector<16x1xf32>
    %101 = vector.broadcast %100 : vector<16x1xf32> to vector<16x32xf32>
    %102 = arith.subf %96, %101 : vector<16x32xf32>
    %103 = arith.mulf %102, %102 : vector<16x32xf32>
    %cst_32 = arith.constant dense<0.000000e+00> : vector<16xf32>
    %104 = vector.multi_reduction <add>, %103, %cst_32 [1] : vector<16x32xf32> to vector<16xf32>
    %105 = vector.shape_cast %104 : vector<16xf32> to vector<16x1xf32>
    %cst_33 = arith.constant 3.200000e+01 : f32
    %106 = vector.broadcast %cst_33 : f32 to vector<16x1xf32>
    %107 = arith.divf %105, %106 : vector<16x1xf32>
    %108 = vector.broadcast %100 : vector<16x1xf32> to vector<16x32xf32>
    %109 = arith.subf %96, %108 : vector<16x32xf32>
    %cst_34 = arith.constant 9.99999974E-6 : f32
    %110 = vector.broadcast %cst_34 : f32 to vector<16x1xf32>
    %111 = arith.addf %107, %110 : vector<16x1xf32>
    %112 = math.rsqrt %111 : vector<16x1xf32>
    %113 = vector.broadcast %112 : vector<16x1xf32> to vector<16x32xf32>
    %114 = arith.mulf %109, %113 : vector<16x32xf32>
    %115 = vector.broadcast %21 : vector<1x32xf32> to vector<16x32xf32>
    %116 = arith.mulf %114, %115 : vector<16x32xf32>
    %117 = vector.broadcast %22 : vector<1x32xf32> to vector<16x32xf32>
    %118 = arith.addf %116, %117 : vector<16x32xf32>
    %c264 = arith.constant 264 : index
    %c0_35 = arith.constant 0 : index
    %119 = vector.load %arg1[%c264, %c0_35] : memref<472x128xf32, #tpu.memory_space<vmem>>, vector<32x96xf32>
    %c328 = arith.constant 328 : index
    %c0_36 = arith.constant 0 : index
    %120 = vector.load %arg1[%c328, %c0_36] : memref<472x128xf32, #tpu.memory_space<vmem>>, vector<32x64xf32>
    %c360 = arith.constant 360 : index
    %c0_37 = arith.constant 0 : index
    %121 = vector.load %arg1[%c360, %c0_37] : memref<472x128xf32, #tpu.memory_space<vmem>>, vector<64x32xf32>
    %c424 = arith.constant 424 : index
    %c0_38 = arith.constant 0 : index
    %122 = vector.load %arg1[%c424, %c0_38] : memref<472x128xf32, #tpu.memory_space<vmem>>, vector<8x128xf32>
    %123 = vector.extract_strided_slice %122 {offsets = [0, 0], sizes = [1, 96], strides = [1, 1]} : vector<8x128xf32> to vector<1x96xf32>
    %124 = vector.extract_strided_slice %122 {offsets = [1, 0], sizes = [1, 32], strides = [1, 1]} : vector<8x128xf32> to vector<1x32xf32>
    %125 = vector.extract_strided_slice %122 {offsets = [3, 0], sizes = [1, 32], strides = [1, 1]} : vector<8x128xf32> to vector<1x32xf32>
    %126 = vector.extract_strided_slice %122 {offsets = [2, 0], sizes = [1, 64], strides = [1, 1]} : vector<8x128xf32> to vector<1x64xf32>
    %127 = vector.extract_strided_slice %122 {offsets = [4, 0], sizes = [1, 32], strides = [1, 1]} : vector<8x128xf32> to vector<1x32xf32>
    %128 = vector.extract_strided_slice %122 {offsets = [5, 0], sizes = [1, 32], strides = [1, 1]} : vector<8x128xf32> to vector<1x32xf32>
    %129 = vector.extract_strided_slice %122 {offsets = [6, 0], sizes = [1, 32], strides = [1, 1]} : vector<8x128xf32> to vector<1x32xf32>
    %130 = vector.extract_strided_slice %122 {offsets = [7, 0], sizes = [1, 32], strides = [1, 1]} : vector<8x128xf32> to vector<1x32xf32>
    %cst_39 = arith.constant dense<0.000000e+00> : vector<16x96xf32>
    %131 = tpu.matmul %118, %119, %cst_39 {dimension_numbers = #tpu.dot_dimension_numbers<[1], [0], [0], [1], [0, 0, 1, 1], [], []>} : vector<16x32xf32>, vector<32x96xf32>, vector<16x96xf32> -> vector<16x96xf32>
    %132 = vector.broadcast %123 : vector<1x96xf32> to vector<16x96xf32>
    %133 = arith.addf %131, %132 : vector<16x96xf32>
    %134 = vector.extract_strided_slice %133 {offsets = [0, 0], sizes = [16, 16], strides = [1, 1]} : vector<16x96xf32> to vector<16x16xf32>
    %135 = vector.extract_strided_slice %133 {offsets = [0, 32], sizes = [16, 16], strides = [1, 1]} : vector<16x96xf32> to vector<16x16xf32>
    %136 = vector.extract_strided_slice %133 {offsets = [0, 64], sizes = [16, 16], strides = [1, 1]} : vector<16x96xf32> to vector<16x16xf32>
    %cst_40 = arith.constant dense<0.000000e+00> : vector<16x16xf32>
    %137 = tpu.matmul %134, %135, %cst_40 {dimension_numbers = #tpu.dot_dimension_numbers<[1], [1], [0], [0], [0, 0, 1, 0], [], []>} : vector<16x16xf32>, vector<16x16xf32>, vector<16x16xf32> -> vector<16x16xf32>
    %138 = arith.addf %137, %10 : vector<16x16xf32>
    %cst_41 = arith.constant dense<0xFF800000> : vector<16xf32>
    %139 = vector.multi_reduction <maximumf>, %138, %cst_41 [1] : vector<16x16xf32> to vector<16xf32>
    %140 = vector.shape_cast %139 : vector<16xf32> to vector<16x1xf32>
    %141 = vector.broadcast %140 : vector<16x1xf32> to vector<16x16xf32>
    %142 = arith.subf %138, %141 : vector<16x16xf32>
    %143 = math.exp %142 : vector<16x16xf32>
    %cst_42 = arith.constant dense<0.000000e+00> : vector<16xf32>
    %144 = vector.multi_reduction <add>, %143, %cst_42 [1] : vector<16x16xf32> to vector<16xf32>
    %145 = vector.shape_cast %144 : vector<16xf32> to vector<16x1xf32>
    %146 = tpu.reciprocal %145 {approx = true} : vector<16x1xf32> -> vector<16x1xf32>
    %147 = vector.broadcast %146 : vector<16x1xf32> to vector<16x16xf32>
    %148 = arith.mulf %143, %147 : vector<16x16xf32>
    %cst_43 = arith.constant dense<0.000000e+00> : vector<16x16xf32>
    %149 = tpu.matmul %148, %136, %cst_43 {dimension_numbers = #tpu.dot_dimension_numbers<[1], [0], [0], [1], [0, 0, 1, 1], [], []>} : vector<16x16xf32>, vector<16x16xf32>, vector<16x16xf32> -> vector<16x16xf32>
    %c296 = arith.constant 296 : index
    %c0_44 = arith.constant 0 : index
    %150 = vector.load %arg1[%c296, %c0_44] : memref<472x128xf32, #tpu.memory_space<vmem>>, vector<16x32xf32>
    %cst_45 = arith.constant dense<0.000000e+00> : vector<16x32xf32>
    %151 = tpu.matmul %149, %150, %cst_45 {dimension_numbers = #tpu.dot_dimension_numbers<[1], [0], [0], [1], [0, 0, 1, 1], [], []>} : vector<16x16xf32>, vector<16x32xf32>, vector<16x32xf32> -> vector<16x32xf32>
    %152 = vector.broadcast %124 : vector<1x32xf32> to vector<16x32xf32>
    %153 = arith.addf %152, %151 : vector<16x32xf32>
    %154 = vector.extract_strided_slice %133 {offsets = [0, 16], sizes = [16, 16], strides = [1, 1]} : vector<16x96xf32> to vector<16x16xf32>
    %155 = vector.extract_strided_slice %133 {offsets = [0, 48], sizes = [16, 16], strides = [1, 1]} : vector<16x96xf32> to vector<16x16xf32>
    %156 = vector.extract_strided_slice %133 {offsets = [0, 80], sizes = [16, 16], strides = [1, 1]} : vector<16x96xf32> to vector<16x16xf32>
    %cst_46 = arith.constant dense<0.000000e+00> : vector<16x16xf32>
    %157 = tpu.matmul %154, %155, %cst_46 {dimension_numbers = #tpu.dot_dimension_numbers<[1], [1], [0], [0], [0, 0, 1, 0], [], []>} : vector<16x16xf32>, vector<16x16xf32>, vector<16x16xf32> -> vector<16x16xf32>
    %158 = arith.addf %157, %10 : vector<16x16xf32>
    %cst_47 = arith.constant dense<0xFF800000> : vector<16xf32>
    %159 = vector.multi_reduction <maximumf>, %158, %cst_47 [1] : vector<16x16xf32> to vector<16xf32>
    %160 = vector.shape_cast %159 : vector<16xf32> to vector<16x1xf32>
    %161 = vector.broadcast %160 : vector<16x1xf32> to vector<16x16xf32>
    %162 = arith.subf %158, %161 : vector<16x16xf32>
    %163 = math.exp %162 : vector<16x16xf32>
    %cst_48 = arith.constant dense<0.000000e+00> : vector<16xf32>
    %164 = vector.multi_reduction <add>, %163, %cst_48 [1] : vector<16x16xf32> to vector<16xf32>
    %165 = vector.shape_cast %164 : vector<16xf32> to vector<16x1xf32>
    %166 = tpu.reciprocal %165 {approx = true} : vector<16x1xf32> -> vector<16x1xf32>
    %167 = vector.broadcast %166 : vector<16x1xf32> to vector<16x16xf32>
    %168 = arith.mulf %163, %167 : vector<16x16xf32>
    %cst_49 = arith.constant dense<0.000000e+00> : vector<16x16xf32>
    %169 = tpu.matmul %168, %156, %cst_49 {dimension_numbers = #tpu.dot_dimension_numbers<[1], [0], [0], [1], [0, 0, 1, 1], [], []>} : vector<16x16xf32>, vector<16x16xf32>, vector<16x16xf32> -> vector<16x16xf32>
    %c312 = arith.constant 312 : index
    %c0_50 = arith.constant 0 : index
    %170 = vector.load %arg1[%c312, %c0_50] : memref<472x128xf32, #tpu.memory_space<vmem>>, vector<16x32xf32>
    %cst_51 = arith.constant dense<0.000000e+00> : vector<16x32xf32>
    %171 = tpu.matmul %169, %170, %cst_51 {dimension_numbers = #tpu.dot_dimension_numbers<[1], [0], [0], [1], [0, 0, 1, 1], [], []>} : vector<16x16xf32>, vector<16x32xf32>, vector<16x32xf32> -> vector<16x32xf32>
    %172 = arith.addf %153, %171 : vector<16x32xf32>
    %173 = arith.addf %118, %172 : vector<16x32xf32>
    %cst_52 = arith.constant dense<0.000000e+00> : vector<16xf32>
    %174 = vector.multi_reduction <add>, %173, %cst_52 [1] : vector<16x32xf32> to vector<16xf32>
    %175 = vector.shape_cast %174 : vector<16xf32> to vector<16x1xf32>
    %cst_53 = arith.constant 3.200000e+01 : f32
    %176 = vector.broadcast %cst_53 : f32 to vector<16x1xf32>
    %177 = arith.divf %175, %176 : vector<16x1xf32>
    %178 = vector.broadcast %177 : vector<16x1xf32> to vector<16x32xf32>
    %179 = arith.subf %173, %178 : vector<16x32xf32>
    %180 = arith.mulf %179, %179 : vector<16x32xf32>
    %cst_54 = arith.constant dense<0.000000e+00> : vector<16xf32>
    %181 = vector.multi_reduction <add>, %180, %cst_54 [1] : vector<16x32xf32> to vector<16xf32>
    %182 = vector.shape_cast %181 : vector<16xf32> to vector<16x1xf32>
    %cst_55 = arith.constant 3.200000e+01 : f32
    %183 = vector.broadcast %cst_55 : f32 to vector<16x1xf32>
    %184 = arith.divf %182, %183 : vector<16x1xf32>
    %185 = vector.broadcast %177 : vector<16x1xf32> to vector<16x32xf32>
    %186 = arith.subf %173, %185 : vector<16x32xf32>
    %cst_56 = arith.constant 9.99999974E-6 : f32
    %187 = vector.broadcast %cst_56 : f32 to vector<16x1xf32>
    %188 = arith.addf %184, %187 : vector<16x1xf32>
    %189 = math.rsqrt %188 : vector<16x1xf32>
    %190 = vector.broadcast %189 : vector<16x1xf32> to vector<16x32xf32>
    %191 = arith.mulf %186, %190 : vector<16x32xf32>
    %192 = vector.broadcast %127 : vector<1x32xf32> to vector<16x32xf32>
    %193 = arith.mulf %191, %192 : vector<16x32xf32>
    %194 = vector.broadcast %128 : vector<1x32xf32> to vector<16x32xf32>
    %195 = arith.addf %193, %194 : vector<16x32xf32>
    %cst_57 = arith.constant dense<0.000000e+00> : vector<16x64xf32>
    %196 = tpu.matmul %195, %120, %cst_57 {dimension_numbers = #tpu.dot_dimension_numbers<[1], [0], [0], [1], [0, 0, 1, 1], [], []>} : vector<16x32xf32>, vector<32x64xf32>, vector<16x64xf32> -> vector<16x64xf32>
    %197 = vector.broadcast %126 : vector<1x64xf32> to vector<16x64xf32>
    %198 = arith.addf %196, %197 : vector<16x64xf32>
    %cst_58 = arith.constant 0.000000e+00 : f32
    %199 = vector.broadcast %cst_58 : f32 to vector<16x64xf32>
    %200 = arith.maximumf %198, %199 : vector<16x64xf32>
    %cst_59 = arith.constant dense<0.000000e+00> : vector<16x32xf32>
    %201 = tpu.matmul %200, %121, %cst_59 {dimension_numbers = #tpu.dot_dimension_numbers<[1], [0], [0], [1], [0, 0, 1, 1], [], []>} : vector<16x64xf32>, vector<64x32xf32>, vector<16x32xf32> -> vector<16x32xf32>
    %202 = vector.broadcast %125 : vector<1x32xf32> to vector<16x32xf32>
    %203 = arith.addf %201, %202 : vector<16x32xf32>
    %204 = arith.addf %195, %203 : vector<16x32xf32>
    %cst_60 = arith.constant dense<0.000000e+00> : vector<16xf32>
    %205 = vector.multi_reduction <add>, %204, %cst_60 [1] : vector<16x32xf32> to vector<16xf32>
    %206 = vector.shape_cast %205 : vector<16xf32> to vector<16x1xf32>
    %cst_61 = arith.constant 3.200000e+01 : f32
    %207 = vector.broadcast %cst_61 : f32 to vector<16x1xf32>
    %208 = arith.divf %206, %207 : vector<16x1xf32>
    %209 = vector.broadcast %208 : vector<16x1xf32> to vector<16x32xf32>
    %210 = arith.subf %204, %209 : vector<16x32xf32>
    %211 = arith.mulf %210, %210 : vector<16x32xf32>
    %cst_62 = arith.constant dense<0.000000e+00> : vector<16xf32>
    %212 = vector.multi_reduction <add>, %211, %cst_62 [1] : vector<16x32xf32> to vector<16xf32>
    %213 = vector.shape_cast %212 : vector<16xf32> to vector<16x1xf32>
    %cst_63 = arith.constant 3.200000e+01 : f32
    %214 = vector.broadcast %cst_63 : f32 to vector<16x1xf32>
    %215 = arith.divf %213, %214 : vector<16x1xf32>
    %216 = vector.broadcast %208 : vector<16x1xf32> to vector<16x32xf32>
    %217 = arith.subf %204, %216 : vector<16x32xf32>
    %cst_64 = arith.constant 9.99999974E-6 : f32
    %218 = vector.broadcast %cst_64 : f32 to vector<16x1xf32>
    %219 = arith.addf %215, %218 : vector<16x1xf32>
    %220 = math.rsqrt %219 : vector<16x1xf32>
    %221 = vector.broadcast %220 : vector<16x1xf32> to vector<16x32xf32>
    %222 = arith.mulf %217, %221 : vector<16x32xf32>
    %223 = vector.broadcast %129 : vector<1x32xf32> to vector<16x32xf32>
    %224 = arith.mulf %222, %223 : vector<16x32xf32>
    %225 = vector.broadcast %130 : vector<1x32xf32> to vector<16x32xf32>
    %226 = arith.addf %224, %225 : vector<16x32xf32>
    %c88 = arith.constant 88 : index
    %c0_65 = arith.constant 0 : index
    %227 = vector.load %arg1[%c88, %c0_65] : memref<472x128xf32, #tpu.memory_space<vmem>>, vector<2x16xf32>
    %cst_66 = arith.constant dense<0.000000e+00> : vector<2x32xf32>
    %228 = tpu.matmul %227, %226, %cst_66 {dimension_numbers = #tpu.dot_dimension_numbers<[1], [0], [0], [1], [0, 0, 1, 1], [], []>} : vector<2x16xf32>, vector<16x32xf32>, vector<2x32xf32> -> vector<2x32xf32>
    %c432 = arith.constant 432 : index
    %c0_67 = arith.constant 0 : index
    %229 = vector.load %arg1[%c432, %c0_67] : memref<472x128xf32, #tpu.memory_space<vmem>>, vector<32x4xf32>
    %c464 = arith.constant 464 : index
    %c0_68 = arith.constant 0 : index
    %230 = vector.load %arg1[%c464, %c0_68] : memref<472x128xf32, #tpu.memory_space<vmem>>, vector<1x4xf32>
    %cst_69 = arith.constant dense<0.000000e+00> : vector<2x4xf32>
    %231 = tpu.matmul %228, %229, %cst_69 {dimension_numbers = #tpu.dot_dimension_numbers<[1], [0], [0], [1], [0, 0, 1, 1], [], []>} : vector<2x32xf32>, vector<32x4xf32>, vector<2x4xf32> -> vector<2x4xf32>
    %232 = vector.broadcast %230 : vector<1x4xf32> to vector<2x4xf32>
    %233 = arith.addf %231, %232 : vector<2x4xf32>
    %c0_70 = arith.constant 0 : index
    %c0_71 = arith.constant 0 : index
    %234 = vector.load %arg2[%c0_70, %c0_71] : memref<2x4xf32, #tpu.memory_space<vmem>>, vector<2x4xf32>
    tpu.vector_store %arg2[%c0_70, %c0_71], %233 {strides = array<i32>} : memref<2x4xf32, #tpu.memory_space<vmem>>, vector<2x4xf32>,
    return
  }
}

</mosaic_0001>

<bundles_post_ra>
// kernel: tpu_custom_call.1
= control target key start
LH: loop header
LB: loop body
LE: loop exit
PB: predicated region body
PF: predicated region fallthrough
CT: control target
= control target key end

     0   :  { %7 = vsyncpa [#allocation3], 0  ;;  %s3093_s0 = inlined_call_operand.vmem [shape: s32[16,1], index: 0, kind: input, shape index: {}]   ;;  %s3094_s1 = inlined_call_operand.hbm [shape: f32[472,128], index: 1, kind: input, shape index: {}]   ;;  %s3095_s2 = inlined_call_operand.hbm [shape: f32[2,4], index: 2, kind: output, shape index: {}]  }
   0x1   :  { %8 = vsyncpa [#allocation4], 0  ;;  %s2829_s9 = smov [#allocation2]   ;;  %s2781_s13 = scalar_lea.hbm %s3094_s1, 7552 }
   0x2   :  { %s16_s10 = sshll.u32 %s2829_s9, 4  ;;  %p2782_p0 = scmp.ne.s32.totalorder %s3094_s1, %s2781_s13  ;;  %s17_s10 = int_to_ptr.vmem [resolvable:$true] %s16_s10 }
   0x3   :  { %p2785_p1 = scmp.lt.u32.totalorder %s2781_s13, %s3094_s1 }
   0x5   :  { %p2787_p2 = pnand %p2785_p1, %p2782_p0 }
   0x7   :  { %2790 = shalt.err (!%p2787_p2)
}
   0x8   :  { %s2791_s18 = scalar_lea.vmem %s17_s10, 7552  ;;  %p2796_p4 = scmp.lt.s32.totalorder %s17_s10, %s17_s10 }
   0x9   :  { %p2792_p3 = scmp.ne.s32.totalorder %s17_s10, %s2791_s18  ;;  %p2797_p5 = scmp.lt.s32.totalorder %s2791_s18, %s2791_s18 }
   0xb   :  { %p2798_p6 = por %p2797_p5, %p2796_p4 }
   0xd   :  { %p2799_p7 = pnand %p2798_p6, %p2792_p3 }
   0xf   :  { %2802 = shalt.err (!%p2799_p7)
}
  0x10   :  { %s2830_s19 = smov 128   ;;  %s2831_s20 = smov 8  }
  0x11   :  { %22 = dma.hbm_to_vmem [thread:$0]  %s3094_s1, 7552, %s17_s10, [#allocation3], %s2830_s19, %s2830_s19, %s2831_s20  }
  0x12   :  { %2825 = dma.done.wait [#allocation3], 7552  }
  0x13   :  { %2826 = vsyncadd [#allocation3], 4294959744  ;;  %v2832_v0 = vmov 0   ;;  %v26_v1 = vld [vmem:[%s3093_s0] sm:$0xff]  ;;  %v43_v3 = vld [vmem:[#allocation2 + $0x8] sm:$0xff]  ;;  %vm58_vm0 = vcmask 1041408   ;;  %v28_v16 = vlaneseq }
  0x14   :  { %2692 = vset.pattern.permute.xlu0 %v2832_v0  ;;  %v42_v2 = vld [vmem:[#allocation2] sm:$0xff]  ;;  %v44_v4 = vld [vmem:[#allocation2 + $0x10] sm:$0xff]  ;;  %v45_v5 = vld [vmem:[#allocation2 + $0x18] sm:$0xff]  ;;  %vm51_vm1 = vcmask 408576   ;;  %v2833_v19 = vmov 0.0   ;;  %vm160_vm4 = vcmask 261120  }
  0x15   :  { %31 = vperm.xlu0 %2692, %v26_v1   ;;  %v27_v6 = vld [vmem:[%s3093_s0 + $0x8] sm:$0xff]  ;;  %v2530_v7 = vpack.c.bf16 %v43_v3, %v42_v2  ;;  %v2534_v8 = vpack.c.bf16 %v45_v5, %v44_v4  ;;  %v46_v9 = vld [vmem:[#allocation2 + $0x20] sm:$0xff]  ;;  %v48_v15 = vld [vmem:[#allocation2 + $0x30] sm:$0x3]  ;;  %v29_v17 = vand.u32 127, %v28_v16  ;;  %v2885_v32 = vshrl.u32 %v28_v16, 7 }
  0x16   :  { %v47_v10 = vld [vmem:[#allocation2 + $0x28] sm:$0xff]  ;;  %v139_v12 = vld [vmem:[#allocation2 + $0x60] sm:$0xff]  ;;  %v141_v23 = vld [vmem:[#allocation2 + $0x70] sm:$0xff]  ;;  %vm248_vm5 = vcmask 130048   ;;  %s2834_s0 = smov 96   ;;  %s2835_s1 = smov 80  }
  0x17   :  { %2531 = vmatprep.subr.bf16.mxu0 %v2530_v7  ;;  %v2538_v11 = vpack.c.bf16 %v47_v10, %v46_v9  ;;  %v140_v13 = vld [vmem:[#allocation2 + $0x68] sm:$0xff]  ;;  %v142_v24 = vld [vmem:[#allocation2 + $0x78] sm:$0xff]  ;;  %v50_v27 = vld [vmem:[#allocation2 + $0x40] sm:$0xff]  ;;  %v158_v33 = vsub.s32 0, %v2885_v32  ;;  %s2836_s27 = smov 112   ;;  %s2837_s28 = smov 64  }
  0x18   :  { %2533 = vmatpush3.bf16.msra.mxu0 %v2530_v7  ;;  %v2542_v14 = vpack.c.bf16 %v140_v13, %v139_v12  ;;  %v2546_v25 = vpack.c.bf16 %v142_v24, %v141_v23  ;;  %v49_v26 = vld [vmem:[#allocation2 + $0x38] sm:$0xff]  ;;  %v2888_v34 = vld [vmem:[#allocation2 + $0x100] sm:$0xff]  ;;  %vm2900_vm6 = vmpackc.low %vm248_vm5, %vm248_vm5  ;;  %s2838_s29 = smov 48   ;;  %vm947_vm7 = vcmask 523264   ;;  %vm2840_vm8 = vmmov 0   ;;  %s2841_s30 = smov [#allocation5]  }
  0x19   :  { %34 = vperm.xlu0 %2692, %v27_v6   ;;  %2535 = vmatprep.subr.bf16.mxu0 %v2534_v8  ;;  %v159_v35 = vrot.slane %v2888_v34, %v158_v33  ;;  %v2909_v46 = vld [vmem:[#allocation2 + $0x50] sm:$0xff]  ;;  %v2911_v47 = vld [vmem:[#allocation2 + $0x48] sm:$0xff]  ;;  %v441_v0 = vld [vmem:[#allocation2 + $0x80] sm:$0xff]  ;;  %s2159_s3 = sshll.u32 %s2841_s30, 4  ;;  %vm2151_vm9 = vcmask 25600   ;;  %s2160_s3 = int_to_ptr.vmem [resolvable:$true] %s2159_s3 }
  0x1a   :  { %2543 = vmatprep.subr.bf16.mxu1 %v2542_v14  ;;  %v442_v1 = vld [vmem:[#allocation2 + $0x88] sm:$0xff]  ;;  %s2803_s4 = scalar_lea.vmem %s2160_s3, 32  ;;  %p2808_p9 = scmp.lt.s32.totalorder %s2160_s3, %s2160_s3 }
  0x1b   :  { %2545 = vmatpush3.bf16.msra.mxu1 %v2542_v14  ;;  %v2560_v2 = vpack.c.bf16 %v442_v1, %v441_v0  ;;  %p2804_p8 = scmp.ne.s32.totalorder %s2160_s3, %s2803_s4  ;;  %p2809_p10 = scmp.lt.s32.totalorder %s2803_s4, %s2803_s4 }
  0x1c   :  { %2537 = vmatpush3.bf16.msra.mxu0 %v2534_v8  ;;  %2547 = vmatprep.subr.bf16.mxu1 %v2546_v25 }
  0x1d   :  { %2539 = vmatprep.subr.bf16.mxu0 %v2538_v11  ;;  %p2810_p11 = por %p2809_p10, %p2808_p9 }
  0x1f   :  { %2549 = vmatpush3.bf16.msra.mxu1 %v2546_v25  ;;  %p2811_p12 = pnand %p2810_p11, %p2804_p8 }
  0x20   :  { %2541 = vmatpush3.bf16.msra.mxu0 %v2538_v11 }
  0x21   :  { %2341 = vmatprep.subr.msk.mxu0 %vm58_vm0, %v48_v15 }
  0x24   :  { %2342 = vmatpush3.msk.msra.mxu0 %vm58_vm0, %v48_v15 }
  0x94   :  { %v32_v18 = vpop.permute.xlu0 %31 }
  0x95   :  { %vm36_vm2 = vcmp.eq.s32.totalorder %v32_v18, %v29_v17 }
  0x96   :  { %v2168_v20 = vsel %vm36_vm2, 1.0, %v2833_v19 }
  0x97   :  { %2343 = vmatprep.mubr.msk.f32.mxu0 %vm51_vm1, %v2168_v20 }
  0x98   :  { %v35_v21 = vpop.permute.xlu0 %34 }
  0x99   :  { %vm37_vm3 = vcmp.eq.s32.totalorder %v35_v21, %v29_v17 }
  0x9a   :  { %v2169_v22 = vsel %vm37_vm3, 1.0, %v2833_v19 }
  0x9b   :  { %2344 = vmatmul.mubr.msk.f32.vlgmr.msra.gmra.mrb[0].mxu0 %vm51_vm1, %v2169_v22 }
 0x16e   :  { %v2345_v28 = vpop.f32.mrb[0].mxu0 }
 0x16f   :  { %v128_v29 = vpop.f32.mrb[1].mxu0  ;;  %v2879_v31 = vadd.f32 %v2345_v28, %v50_v27 }
 0x170   :  { %v2877_v30 = vadd.f32 %v128_v29, %v49_v26 }
 0x172   :  { %2354 = vmatprep.mubr.msk.f32.mxu1 %vm160_vm4, %v2877_v30 }
 0x173   :  { %2355 = vmatmul.mubr.msk.f32.vlgmr.msra.gmra.mrb[0].mxu1 %vm160_vm4, %v2879_v31 }
 0x246   :  { %v2356_v36 = vpop.f32.mrb[0].mxu1 }
 0x247   :  { %v239_v37 = vadd.f32 %v2356_v36, %v159_v35  ;;  %v233_v38 = vpop.f32.mrb[1].mxu1 }
 0x248   :  { %v234_v39 = vadd.f32 %v233_v38, %v159_v35 }
 0x24a   :  { %2361 = vmatprep.mubr.msk.f32.mxu1 %vm248_vm5, %v234_v39  ;;  %v2894_v40 = vpack.i.bf16 %v239_v37, %v234_v39 }
 0x24c   :  { %2694 = vrot.lane.b32.xlu1 %v2894_v40, %s2834_s0 }
 0x2be   :  { %v2695_v41 = vpop.permute.xlu1 %2694 }
 0x2bf   :  { %v2697_v42 = vunpack.i.h.bf16 %v2695_v41  ;;  %v2696_v43 = vunpack.i.l.bf16 %v2695_v41 }
 0x2c1   :  { %v2550_v45 = vpack.c.bf16 %v2697_v42, %v2696_v43 }
 0x2c3   :  { %2552 = vmatprep.subr.msk.bf16.mxu1 %vm2900_vm6, %v2550_v45 }
 0x2c4   :  { %2555 = vmatpush3.bf16.xpose.msk.msra.mxu1 %vm2900_vm6, %v2550_v45 }
 0x2c5   :  { %2561 = vmatprep.subr.bf16.mxu1 %v2560_v2 }
 0x2cb   :  { %2362 = vmatmul.mubr.msk.f32.vlgmr.msra.gmra.mrb[2].mxu1 %vm248_vm5, %v239_v37 }
 0x2cc   :  { %2563 = vmatpush3.bf16.msra.mxu1 %v2560_v2 }
 0x39e   :  { %v2363_v48 = vpop.f32.mrb[2].mxu1 }
 0x39f   :  { %v329_v49 = vadd.f32 %v2363_v48, %v2909_v46  ;;  %v323_v50 = vpop.f32.mrb[3].mxu1 }
 0x3a0   :  { %v324_v51 = vadd.f32 %v323_v50, %v2911_v47  ;;  %v730_v50 = vld [vmem:[#allocation2 + $0x90] sm:$0xff] }
 0x3a1   :  { %v335_v52 = vsel %vm248_vm5, %v329_v49, -inf }
 0x3a2   :  { %336 = vmax.xlane.f32.xlu0 %v335_v52  ;;  %v332_v53 = vsel %vm248_vm5, %v324_v51, -inf }
 0x3a3   :  { %333 = vmax.xlane.f32.xlu1 %v332_v53 }
 0x42f   :  { %v337_v54 = vpop.xlane.xlu0 %336 }
 0x430   :  { %v339_v55 = vsub.f32 %v329_v49, %v337_v54  ;;  %v334_v56 = vpop.xlane.xlu1 %333 }
 0x431   :  { %v338_v57 = vsub.f32 %v324_v51, %v334_v56  ;;  %v731_v51 = vld [vmem:[#allocation2 + $0x98] sm:$0xff] }
 0x432   :  { %v342_v58 = vmul.f32 1.442695, %v339_v55  ;;  %v2574_v55 = vpack.c.bf16 %v731_v51, %v730_v50 }
 0x433   :  { %v340_v59 = vmul.f32 1.442695, %v338_v57 }
 0x434   :  { %2733 = vpow2.f32 %v342_v58 }
 0x435   :  { %2735 = vpow2.f32 %v340_v59 }
 0x43e   :  { %v2734_v60 = vpop.eup %2733 }
 0x43f   :  { %v2736_v61 = vpop.eup %2735  ;;  %v347_v62 = vsel %vm248_vm5, %v2734_v60, 0.0 }
 0x440   :  { %348 = vadd.xlane.f32.xlu1 %v347_v62  ;;  %v344_v63 = vsel %vm248_vm5, %v2736_v61, 0.0 }
 0x441   :  { %345 = vadd.xlane.f32.xlu0 %v344_v63 }
 0x451   :  { %2704 = vrot.lane.b32.xlu1 %v2894_v40, %s2835_s1 }
 0x455   :  { %530 = vrot.lane.b32.xlu1 %v234_v39, %s2836_s27 }
 0x457   :  { %2699 = vrot.lane.b32.xlu0 %v2894_v40, %s2837_s28 }
 0x45b   :  { %532 = vrot.lane.b32.xlu0 %v239_v37, %s2836_s27 }
 0x4cd   :  { %v349_v3 = vpop.xlane.xlu1 %348 }
 0x4ce   :  { %2737 = vrcp.f32 %v349_v3  ;;  %v346_v4 = vpop.xlane.xlu0 %345 }
 0x4cf   :  { %2739 = vrcp.f32 %v346_v4 }
 0x4d1   :  { %v2705_v5 = vpop.permute.xlu1 %2704 }
 0x4d2   :  { %v2700_v6 = vpop.permute.xlu0 %2699  ;;  %v2707_v7 = vunpack.i.h.bf16 %v2705_v5  ;;  %v2706_v8 = vunpack.i.l.bf16 %v2705_v5 }
 0x4d3   :  { %v2702_v9 = vunpack.i.h.bf16 %v2700_v6  ;;  %v2701_v10 = vunpack.i.l.bf16 %v2700_v6 }
 0x4d4   :  { %v2564_v12 = vpack.c.bf16 %v2707_v7, %v2706_v8 }
 0x4d5   :  { %v2556_v11 = vpack.c.bf16 %v2702_v9, %v2701_v10  ;;  %v531_v17 = vpop.permute.xlu1 %530 }
 0x4d6   :  { %v533_v18 = vpop.permute.xlu0 %532 }
 0x4d7   :  { %2557 = vmatprep.subr.bf16.mxu0 %v2556_v11 }
 0x4d8   :  { %v2738_v13 = vpop.eup %2737  ;;  %2559 = vmatpush3.bf16.msra.mxu0 %v2556_v11 }
 0x4d9   :  { %v2740_v14 = vpop.eup %2739  ;;  %2566 = vmatprep.subr.msk.bf16.mxu0 %vm2900_vm6, %v2564_v12  ;;  %v353_v16 = vmul.f32 %v2738_v13, %v2734_v60 }
 0x4da   :  { %v352_v15 = vmul.f32 %v2740_v14, %v2736_v61  ;;  %v526_v61 = vsub.s32 1, %v2885_v32 }
 0x4dc   :  { %2368 = vmatprep.mubr.msk.f32.mxu0 %vm248_vm5, %v352_v15  ;;  %v527_v62 = vrot.slane %v2888_v34, %v526_v61 }
 0x4dd   :  { %2369 = vmatmul.mubr.msk.f32.vlgmr.msra.gmra.mrb[2].mxu0 %vm248_vm5, %v353_v16  ;;  %v143_v16 = vld [vmem:[#allocation2 + $0xa0] sm:$0xff] }
 0x4de   :  { %2382 = vmatprep.mubr.msk.f32.mxu0 %vm248_vm5, %v531_v17 }
 0x4e1   :  { %2569 = vmatpush3.bf16.xpose.msk.msra.mxu0 %vm2900_vm6, %v2564_v12 }
 0x4e8   :  { %2383 = vmatmul.mubr.msk.f32.vlgmr.msra.gmra.mrb[4].mxu0 %vm248_vm5, %v533_v18  ;;  %v145_v18 = vld [vmem:[#allocation2 + $0xb0] sm:$0xff] }
 0x5b0   :  { %v2370_v20 = vpop.f32.mrb[2].mxu0 }
 0x5b1   :  { %v432_v21 = vpop.f32.mrb[3].mxu0 }
 0x5b2   :  { %2375 = vmatprep.mubr.msk.f32.mxu1 %vm248_vm5, %v432_v21 }
 0x5b3   :  { %2376 = vmatmul.mubr.msk.f32.vlgmr.msra.gmra.mrb[4].mxu1 %vm248_vm5, %v2370_v20  ;;  %v146_v20 = vld [vmem:[#allocation2 + $0xb8] sm:$0xff] }
 0x5b4   :  { %v2582_v21 = vpack.c.bf16 %v146_v20, %v145_v18 }
 0x5bb   :  { %v2384_v22 = vpop.f32.mrb[4].mxu0 }
 0x5bc   :  { %v618_v23 = vadd.f32 %v2384_v22, %v2909_v46  ;;  %v612_v24 = vpop.f32.mrb[5].mxu0  ;;  %v147_v22 = vld [vmem:[#allocation2 + $0xc0] sm:$0xff] }
 0x5bd   :  { %v613_v25 = vadd.f32 %v612_v24, %v2911_v47  ;;  %v149_v24 = vld [vmem:[#allocation2 + $0xd0] sm:$0xff] }
 0x5be   :  { %v624_v26 = vsel %vm248_vm5, %v618_v23, -inf }
 0x5bf   :  { %625 = vmax.xlane.f32.xlu0 %v624_v26  ;;  %v621_v27 = vsel %vm248_vm5, %v613_v25, -inf  ;;  %v150_v26 = vld [vmem:[#allocation2 + $0xd8] sm:$0xff] }
 0x5c0   :  { %622 = vmax.xlane.f32.xlu1 %v621_v27  ;;  %v2590_v27 = vpack.c.bf16 %v150_v26, %v149_v24  ;;  %v1069_v24 = vld [vmem:[#allocation2 + $0x108] sm:$0xff] }
 0x64c   :  { %v626_v28 = vpop.xlane.xlu0 %625 }
 0x64d   :  { %v628_v29 = vsub.f32 %v618_v23, %v626_v28  ;;  %v623_v35 = vpop.xlane.xlu1 %622  ;;  %v148_v23 = vld [vmem:[#allocation2 + $0xc8] sm:$0xff]  ;;  %v151_v28 = vld [vmem:[#allocation2 + $0xe0] sm:$0xff] }
 0x64e   :  { %v627_v36 = vsub.f32 %v613_v25, %v623_v35  ;;  %v2586_v25 = vpack.c.bf16 %v148_v23, %v147_v22 }
 0x64f   :  { %v631_v37 = vmul.f32 1.442695, %v628_v29  ;;  %v152_v29 = vld [vmem:[#allocation2 + $0xe8] sm:$0xff] }
 0x650   :  { %v629_v38 = vmul.f32 1.442695, %v627_v36  ;;  %v2594_v35 = vpack.c.bf16 %v152_v29, %v151_v28  ;;  %v1072_v28 = vld [vmem:[#allocation2 + $0x120] sm:$0xff] }
 0x651   :  { %2741 = vpow2.f32 %v631_v37 }
 0x652   :  { %2743 = vpow2.f32 %v629_v38 }
 0x65b   :  { %v2742_v39 = vpop.eup %2741 }
 0x65c   :  { %v2744_v41 = vpop.eup %2743  ;;  %v636_v42 = vsel %vm248_vm5, %v2742_v39, 0.0 }
 0x65d   :  { %637 = vadd.xlane.f32.xlu1 %v636_v42  ;;  %v633_v43 = vsel %vm248_vm5, %v2744_v41, 0.0 }
 0x65e   :  { %634 = vadd.xlane.f32.xlu0 %v633_v43  ;;  %v846_v43 = vsub.s32 4, %v2885_v32 }
 0x674   :  { %2709 = vrot.lane.b32.xlu0 %v2894_v40, %s2838_s29 }
 0x6ea   :  { %v638_v45 = vpop.xlane.xlu1 %637 }
 0x6eb   :  { %2745 = vrcp.f32 %v638_v45  ;;  %v635_v48 = vpop.xlane.xlu0 %634  ;;  %v852_v45 = vsub.s32 5, %v2885_v32 }
 0x6ec   :  { %2747 = vrcp.f32 %v635_v48  ;;  %v847_v48 = vrot.slane %v2888_v34, %v846_v43 }
 0x6ed   :  { %v853_v51 = vrot.slane %v2888_v34, %v852_v45 }
 0x6ef   :  { %v2710_v49 = vpop.permute.xlu0 %2709 }
 0x6f0   :  { %v2712_v52 = vunpack.i.h.bf16 %v2710_v49  ;;  %v2711_v53 = vunpack.i.l.bf16 %v2710_v49 }
 0x6f2   :  { %v2570_v54 = vpack.c.bf16 %v2712_v52, %v2711_v53 }
 0x6f4   :  { %2571 = vmatprep.subr.bf16.mxu1 %v2570_v54 }
 0x6f5   :  { %v2746_v56 = vpop.eup %2745  ;;  %2573 = vmatpush3.bf16.msra.mxu1 %v2570_v54 }
 0x6f6   :  { %v2748_v57 = vpop.eup %2747  ;;  %2575 = vmatprep.subr.bf16.mxu1 %v2574_v55  ;;  %v642_v59 = vmul.f32 %v2746_v56, %v2742_v39 }
 0x6f7   :  { %v641_v58 = vmul.f32 %v2748_v57, %v2744_v41 }
 0x6f9   :  { %2389 = vmatprep.mubr.msk.f32.mxu1 %vm248_vm5, %v641_v58  ;;  %v153_v58 = vld [vmem:[#allocation2 + $0xf0] sm:$0xff] }
 0x6fa   :  { %2390 = vmatmul.mubr.msk.f32.vlgmr.msra.gmra.mrb[6].mxu1 %vm248_vm5, %v642_v59  ;;  %v154_v59 = vld [vmem:[#allocation2 + $0xf8] sm:$0xff] }
 0x6fb   :  { %2577 = vmatpush3.bf16.msra.mxu1 %v2574_v55 }
 0x6fc   :  { %2587 = vmatprep.subr.bf16.mxu1 %v2586_v25 }
 0x7cd   :  { %v2391_v40 = vpop.f32.mrb[6].mxu1 }
 0x7ce   :  { %v721_v60 = vpop.f32.mrb[7].mxu1 }
 0x7cf   :  { %2396 = vmatprep.mubr.msk.f32.mxu1 %vm248_vm5, %v721_v60  ;;  %v858_v60 = vsub.s32 2, %v2885_v32 }
 0x7d0   :  { %2397 = vmatmul.mubr.msk.f32.vlgmr.msra.gmra.mrb[4].mxu1 %vm248_vm5, %v2391_v40  ;;  %v2598_v40 = vpack.c.bf16 %v154_v59, %v153_v58  ;;  %v2997_v59 = vld [vmem:[#allocation2 + $0x1a8] sm:$0xff] }
 0x7d1   :  { %2589 = vmatpush3.bf16.msra.mxu1 %v2586_v25  ;;  %v1070_v25 = vld [vmem:[#allocation2 + $0x110] sm:$0xff] }
 0x7d2   :  { %2591 = vmatprep.subr.bf16.mxu1 %v2590_v27  ;;  %v2602_v26 = vpack.c.bf16 %v1070_v25, %v1069_v24 }
 0x7d5   :  { %2593 = vmatpush3.bf16.msra.mxu1 %v2590_v27  ;;  %v1071_v27 = vld [vmem:[#allocation2 + $0x118] sm:$0xff] }
 0x7d6   :  { %2595 = vmatprep.subr.bf16.mxu1 %v2594_v35  ;;  %v2606_v29 = vpack.c.bf16 %v1072_v28, %v1071_v27 }
 0x7d9   :  { %2597 = vmatpush3.bf16.msra.mxu1 %v2594_v35 }
 0x7da   :  { %2599 = vmatprep.subr.bf16.mxu1 %v2598_v40 }
 0x7dd   :  { %2601 = vmatpush3.bf16.msra.mxu1 %v2598_v40 }
 0x8a3   :  { %v2398_v63 = vpop.f32.mrb[4].mxu1 }
 0x8a4   :  { %v804_v0 = vpop.f32.mrb[5].mxu1  ;;  %v2671_v1 = vadd.f32 %v2398_v63, %v527_v62 }
 0x8a5   :  { %v2672_v2 = vadd.f32 %v804_v0, %v527_v62  ;;  %v859_v62 = vrot.slane %v2888_v34, %v858_v60 }
 0x8a6   :  { %v816_v5 = vadd.f32 %v2671_v1, %v2879_v31  ;;  %v144_v31 = vld [vmem:[#allocation2 + $0xa8] sm:$0xff] }
 0x8a7   :  { %v815_v3 = vadd.f32 %v2672_v2, %v2877_v30  ;;  %v2578_v17 = vpack.c.bf16 %v144_v31, %v143_v16 }
 0x8a8   :  { %v820_v6 = vsel %vm160_vm4, %v816_v5, 0.0 }
 0x8a9   :  { %v817_v4 = vsel %vm160_vm4, %v815_v3, 0.0  ;;  %2579 = vmatprep.subr.bf16.mxu0 %v2578_v17 }
 0x8aa   :  { %818 = vadd.xlane.f32.xlu1 %v817_v4  ;;  %2581 = vmatpush3.bf16.msra.mxu0 %v2578_v17 }
 0x8ab   :  { %2583 = vmatprep.subr.bf16.mxu0 %v2582_v21 }
 0x8ae   :  { %821 = vadd.xlane.f32.xlu1 %v820_v6  ;;  %2585 = vmatpush3.bf16.msra.mxu0 %v2582_v21 }
 0x8af   :  { %2603 = vmatprep.subr.bf16.mxu0 %v2602_v26 }
 0x937   :  { %v819_v7 = vpop.xlane.xlu1 %818 }
 0x938   :  { %v824_v8 = vmul.f32 0.03125, %v819_v7 }
 0x93a   :  { %v826_v9 = vsub.f32 %v815_v3, %v824_v8 }
 0x93b   :  { %v822_v10 = vpop.xlane.xlu1 %821 }
 0x93c   :  { %v825_v11 = vmul.f32 0.03125, %v822_v10  ;;  %v828_v12 = vmul.f32 %v826_v9, %v826_v9 }
 0x93e   :  { %v827_v13 = vsub.f32 %v816_v5, %v825_v11  ;;  %v830_v14 = vsel %vm160_vm4, %v828_v12, 0.0  ;;  %v945_v5 = vsub.s32 3, %v2885_v32 }
 0x93f   :  { %831 = vadd.xlane.f32.xlu1 %v830_v14 }
 0x940   :  { %v829_v15 = vmul.f32 %v827_v13, %v827_v13  ;;  %v946_v6 = vrot.slane %v2888_v34, %v945_v5 }
 0x942   :  { %v833_v30 = vsel %vm160_vm4, %v829_v15, 0.0 }
 0x943   :  { %834 = vadd.xlane.f32.xlu1 %v833_v30 }
 0x9cc   :  { %v832_v36 = vpop.xlane.xlu1 %831 }
 0x9cd   :  { %v836_v37 = vmul.f32 0.03125, %v832_v36 }
 0x9cf   :  { %v838_v38 = vadd.f32 1e-05, %v836_v37 }
 0x9d0   :  { %v835_v39 = vpop.xlane.xlu1 %834 }
 0x9d1   :  { %2749 = vrsqrt.f32 %v838_v38  ;;  %v837_v41 = vmul.f32 0.03125, %v835_v39 }
 0x9d3   :  { %v839_v42 = vadd.f32 1e-05, %v837_v41 }
 0x9d5   :  { %2751 = vrsqrt.f32 %v839_v42  ;;  %v1059_v42 = vsub.s32 6, %v2885_v32 }
 0x9db   :  { %v2750_v49 = vpop.eup %2749 }
 0x9dc   :  { %v842_v50 = vmul.f32 %v2750_v49, %v826_v9  ;;  %v1060_v49 = vrot.slane %v2888_v34, %v1059_v42 }
 0x9de   :  { %v848_v52 = vmul.f32 %v847_v48, %v842_v50 }
 0x9df   :  { %v2752_v53 = vpop.eup %2751 }
 0x9e0   :  { %v843_v54 = vmul.f32 %v2752_v53, %v827_v13  ;;  %v854_v55 = vadd.f32 %v853_v51, %v848_v52 }
 0x9e2   :  { %v849_v56 = vmul.f32 %v847_v48, %v843_v54  ;;  %2407 = vmatprep.mubr.msk.f32.mxu0 %vm160_vm4, %v854_v55  ;;  %v1065_v48 = vsub.s32 7, %v2885_v32 }
 0x9e4   :  { %v855_v57 = vadd.f32 %v853_v51, %v849_v56  ;;  %v1066_v52 = vrot.slane %v2888_v34, %v1065_v48  ;;  %v1089_v34 = vrot.slane %v2997_v59, %v158_v33 }
 0x9e6   :  { %2408 = vmatmul.mubr.msk.f32.vlgmr.msra.gmra.mrb[6].mxu0 %vm160_vm4, %v855_v57 }
 0x9e7   :  { %2605 = vmatpush3.bf16.msra.mxu0 %v2602_v26 }
 0x9e8   :  { %2607 = vmatprep.subr.bf16.mxu0 %v2606_v29 }
 0x9eb   :  { %2609 = vmatpush3.bf16.msra.mxu0 %v2606_v29 }
 0xab9   :  { %v2409_v63 = vpop.f32.mrb[6].mxu0 }
 0xaba   :  { %v938_v0 = vadd.f32 %v2409_v63, %v859_v62  ;;  %v932_v1 = vpop.f32.mrb[7].mxu0 }
 0xabb   :  { %v933_v2 = vadd.f32 %v932_v1, %v859_v62 }
 0xabc   :  { %v942_v4 = vmax.f32 %v938_v0, 0.0 }
 0xabd   :  { %v941_v3 = vmax.f32 %v933_v2, 0.0 }
 0xabf   :  { %2426 = vmatprep.mubr.msk.f32.mxu1 %vm947_vm7, %v941_v3 }
 0xac0   :  { %2427 = vmatmul.mubr.msk.f32.vlgmr.msra.gmra.mrb[8].mxu1 %vm947_vm7, %v942_v4 }
 0xb93   :  { %v2428_v7 = vpop.f32.mrb[8].mxu1 }
 0xb94   :  { %v1020_v8 = vpop.f32.mrb[9].mxu1  ;;  %v1026_v9 = vadd.f32 %v2428_v7, %v946_v6 }
 0xb95   :  { %v1021_v10 = vadd.f32 %v1020_v8, %v946_v6 }
 0xb96   :  { %v1030_v13 = vadd.f32 %v1026_v9, %v855_v57 }
 0xb97   :  { %v1029_v11 = vadd.f32 %v1021_v10, %v854_v55 }
 0xb98   :  { %v1034_v14 = vsel %vm160_vm4, %v1030_v13, 0.0 }
 0xb99   :  { %v1031_v12 = vsel %vm160_vm4, %v1029_v11, 0.0 }
 0xb9a   :  { %1032 = vadd.xlane.f32.xlu1 %v1031_v12 }
 0xb9e   :  { %1035 = vadd.xlane.f32.xlu1 %v1034_v14 }
 0xc27   :  { %v1033_v15 = vpop.xlane.xlu1 %1032 }
 0xc28   :  { %v1037_v30 = vmul.f32 0.03125, %v1033_v15 }
 0xc2a   :  { %v1039_v16 = vsub.f32 %v1029_v11, %v1037_v30 }
 0xc2b   :  { %v1036_v31 = vpop.xlane.xlu1 %1035 }
 0xc2c   :  { %v1038_v17 = vmul.f32 0.03125, %v1036_v31  ;;  %v1041_v18 = vmul.f32 %v1039_v16, %v1039_v16 }
 0xc2e   :  { %v1040_v20 = vsub.f32 %v1030_v13, %v1038_v17  ;;  %v1043_v21 = vsel %vm160_vm4, %v1041_v18, 0.0 }
 0xc2f   :  { %1044 = vadd.xlane.f32.xlu0 %v1043_v21 }
 0xc30   :  { %v1042_v22 = vmul.f32 %v1040_v20, %v1040_v20 }
 0xc32   :  { %v1046_v23 = vsel %vm160_vm4, %v1042_v22, 0.0 }
 0xc33   :  { %1047 = vadd.xlane.f32.xlu1 %v1046_v23 }
 0xcbc   :  { %v1045_v35 = vpop.xlane.xlu0 %1044 }
 0xcbd   :  { %v1049_v36 = vmul.f32 0.03125, %v1045_v35 }
 0xcbf   :  { %v1051_v37 = vadd.f32 1e-05, %v1049_v36 }
 0xcc0   :  { %v1048_v38 = vpop.xlane.xlu1 %1047 }
 0xcc1   :  { %2753 = vrsqrt.f32 %v1051_v37  ;;  %v1050_v39 = vmul.f32 0.03125, %v1048_v38 }
 0xcc3   :  { %v1052_v41 = vadd.f32 1e-05, %v1050_v39 }
 0xcc5   :  { %2755 = vrsqrt.f32 %v1052_v41 }
 0xccb   :  { %v2754_v50 = vpop.eup %2753 }
 0xccc   :  { %v1055_v51 = vmul.f32 %v2754_v50, %v1039_v16 }
 0xcce   :  { %v1061_v53 = vmul.f32 %v1060_v49, %v1055_v51 }
 0xccf   :  { %v2756_v54 = vpop.eup %2755 }
 0xcd0   :  { %v1056_v55 = vmul.f32 %v2756_v54, %v1040_v20  ;;  %v2989_v56 = vadd.f32 %v1066_v52, %v1061_v53 }
 0xcd2   :  { %v1062_v57 = vmul.f32 %v1060_v49, %v1056_v55  ;;  %2437 = vmatprep.mubr.msk.f32.mxu0 %vm160_vm4, %v2989_v56 }
 0xcd4   :  { %v2993_v58 = vadd.f32 %v1066_v52, %v1062_v57  ;;  %v1369_v57 = vld [vmem:[#allocation2 + $0x128] sm:$0xff] }
 0xcd6   :  { %2438 = vmatmul.mubr.msk.f32.vlgmr.msra.gmra.mrb[8].mxu0 %vm160_vm4, %v2993_v58 }
 0xda9   :  { %v2439_v40 = vpop.f32.mrb[8].mxu0 }
 0xdaa   :  { %v1168_v62 = vadd.f32 %v2439_v40, %v1089_v34  ;;  %v1162_v63 = vpop.f32.mrb[9].mxu0 }
 0xdab   :  { %v1163_v0 = vadd.f32 %v1162_v63, %v1089_v34  ;;  %v1370_v34 = vld [vmem:[#allocation2 + $0x130] sm:$0xff] }
 0xdac   :  { %1460 = vrot.lane.b32.xlu0 %v1168_v62, %s2836_s27 }
 0xdad   :  { %2444 = vmatprep.mubr.msk.f32.mxu0 %vm248_vm5, %v1163_v0  ;;  %v2713_v1 = vpack.i.bf16 %v1168_v62, %v1163_v0 }
 0xdaf   :  { %2714 = vrot.lane.b32.xlu1 %v2713_v1, %s2834_s0 }
 0xdb3   :  { %2719 = vrot.lane.b32.xlu1 %v2713_v1, %s2835_s1 }
 0xdb7   :  { %1458 = vrot.lane.b32.xlu1 %v1163_v0, %s2836_s27 }
 0xe1e   :  { %v1461_v11 = vpop.permute.xlu0 %1460 }
 0xe21   :  { %v2715_v2 = vpop.permute.xlu1 %2714 }
 0xe22   :  { %v2717_v3 = vunpack.i.h.bf16 %v2715_v2  ;;  %v2716_v4 = vunpack.i.l.bf16 %v2715_v2 }
 0xe24   :  { %v2610_v6 = vpack.c.bf16 %v2717_v3, %v2716_v4 }
 0xe25   :  { %v2720_v33 = vpop.permute.xlu1 %2719 }
 0xe26   :  { %v2722_v7 = vunpack.i.h.bf16 %v2720_v33  ;;  %v2721_v8 = vunpack.i.l.bf16 %v2720_v33  ;;  %2612 = vmatprep.subr.msk.bf16.mxu0 %vm2900_vm6, %v2610_v6 }
 0xe27   :  { %2615 = vmatpush3.bf16.xpose.msk.msra.mxu0 %vm2900_vm6, %v2610_v6 }
 0xe28   :  { %v2624_v9 = vpack.c.bf16 %v2722_v7, %v2721_v8 }
 0xe29   :  { %v1459_v10 = vpop.permute.xlu1 %1458 }
 0xe2a   :  { %2626 = vmatprep.subr.msk.bf16.mxu0 %vm2900_vm6, %v2624_v9 }
 0xe2e   :  { %2445 = vmatmul.mubr.msk.f32.vlgmr.msra.gmra.mrb[10].mxu0 %vm248_vm5, %v1168_v62 }
 0xe2f   :  { %2629 = vmatpush3.bf16.xpose.msk.msra.mxu0 %vm2900_vm6, %v2624_v9  ;;  %2465 = vmatprep.mubr.msk.f32.mxu0 %vm248_vm5, %v1459_v10 }
 0xe36   :  { %2466 = vmatmul.mubr.msk.f32.vlgmr.msra.gmra.mrb[12].mxu0 %vm248_vm5, %v1461_v11  ;;  %v1658_v11 = vld [vmem:[#allocation2 + $0x138] sm:$0xff] }
 0xf01   :  { %v2446_v12 = vpop.f32.mrb[10].mxu0 }
 0xf02   :  { %v1257_v13 = vadd.f32 %v2446_v12, %v2909_v46  ;;  %v1251_v14 = vpop.f32.mrb[11].mxu0  ;;  %v1659_v12 = vld [vmem:[#allocation2 + $0x140] sm:$0xff] }
 0xf03   :  { %v1252_v15 = vadd.f32 %v1251_v14, %v2911_v47 }
 0xf04   :  { %v1263_v30 = vsel %vm248_vm5, %v1257_v13, -inf }
 0xf05   :  { %1264 = vmax.xlane.f32.xlu0 %v1263_v30  ;;  %v1260_v16 = vsel %vm248_vm5, %v1252_v15, -inf  ;;  %v2634_v30 = vpack.c.bf16 %v1659_v12, %v1658_v11 }
 0xf06   :  { %1261 = vmax.xlane.f32.xlu1 %v1260_v16 }
 0xf09   :  { %v2467_v31 = vpop.f32.mrb[12].mxu0 }
 0xf0a   :  { %v1540_v44 = vpop.f32.mrb[13].mxu0  ;;  %v1546_v18 = vadd.f32 %v2467_v31, %v2909_v46 }
 0xf0b   :  { %v1541_v17 = vadd.f32 %v1540_v44, %v2911_v47 }
 0xf0c   :  { %v1552_v21 = vsel %vm248_vm5, %v1546_v18, -inf }
 0xf0d   :  { %v1549_v20 = vsel %vm248_vm5, %v1541_v17, -inf }
 0xf0e   :  { %1550 = vmax.xlane.f32.xlu0 %v1549_v20  ;;  %v1455_v20 = vrot.slane %v2997_v59, %v526_v61 }
 0xf12   :  { %1553 = vmax.xlane.f32.xlu0 %v1552_v21 }
 0xf92   :  { %v1265_v22 = vpop.xlane.xlu0 %1264 }
 0xf93   :  { %v1267_v23 = vsub.f32 %v1257_v13, %v1265_v22  ;;  %v1262_v24 = vpop.xlane.xlu1 %1261 }
 0xf94   :  { %v1266_v25 = vsub.f32 %v1252_v15, %v1262_v24 }
 0xf95   :  { %v1270_v26 = vmul.f32 1.442695, %v1267_v23 }
 0xf96   :  { %v1268_v27 = vmul.f32 1.442695, %v1266_v25 }
 0xf97   :  { %2757 = vpow2.f32 %v1270_v26 }
 0xf98   :  { %2759 = vpow2.f32 %v1268_v27 }
 0xf9b   :  { %v1551_v28 = vpop.xlane.xlu0 %1550 }
 0xf9c   :  { %v1555_v29 = vsub.f32 %v1541_v17, %v1551_v28 }
 0xf9e   :  { %v1557_v35 = vmul.f32 1.442695, %v1555_v29 }
 0xf9f   :  { %v1554_v41 = vpop.xlane.xlu0 %1553 }
 0xfa0   :  { %2761 = vpow2.f32 %v1557_v35  ;;  %v1556_v49 = vsub.f32 %v1546_v18, %v1554_v41  ;;  %v1074_v41 = vld [vmem:[#allocation2 + $0x150] sm:$0xff] }
 0xfa1   :  { %v2758_v47 = vpop.eup %2757 }
 0xfa2   :  { %v1275_v46 = vsel %vm248_vm5, %v2758_v47, 0.0  ;;  %v2760_v36 = vpop.eup %2759  ;;  %v1559_v50 = vmul.f32 1.442695, %v1556_v49 }
 0xfa3   :  { %1276 = vadd.xlane.f32.xlu1 %v1275_v46  ;;  %v1272_v37 = vsel %vm248_vm5, %v2760_v36, 0.0 }
 0xfa4   :  { %2763 = vpow2.f32 %v1559_v50  ;;  %v1075_v50 = vld [vmem:[#allocation2 + $0x158] sm:$0xff] }
 0xfa7   :  { %1273 = vadd.xlane.f32.xlu1 %v1272_v37 }
 0xfaa   :  { %v2762_v38 = vpop.eup %2761 }
 0xfab   :  { %v1561_v39 = vsel %vm248_vm5, %v2762_v38, 0.0 }
 0xfac   :  { %1562 = vadd.xlane.f32.xlu0 %v1561_v39 }
 0xfae   :  { %v2764_v51 = vpop.eup %2763 }
 0xfaf   :  { %v1564_v52 = vsel %vm248_vm5, %v2764_v51, 0.0 }
 0xfb8   :  { %2724 = vrot.lane.b32.xlu1 %v2713_v1, %s2837_s28 }
 0xfc2   :  { %2729 = vrot.lane.b32.xlu0 %v2713_v1, %s2838_s29  ;;  %v2620_v1 = vpack.c.bf16 %v1370_v34, %v1369_v57  ;;  %v1080_v34 = vld [vmem:[#allocation2 + $0x180] sm:$0xff] }
 0xfdc   :  { %1565 = vadd.xlane.f32.xlu1 %v1564_v52 }
0x1030   :  { %v1277_v53 = vpop.xlane.xlu1 %1276 }
0x1031   :  { %2765 = vrcp.f32 %v1277_v53  ;;  %v1077_v53 = vld [vmem:[#allocation2 + $0x168] sm:$0xff] }
0x1034   :  { %v1274_v54 = vpop.xlane.xlu1 %1273 }
0x1035   :  { %2767 = vrcp.f32 %v1274_v54  ;;  %v1078_v54 = vld [vmem:[#allocation2 + $0x170] sm:$0xff] }
0x1036   :  { %v2646_v57 = vpack.c.bf16 %v1078_v54, %v1077_v53 }
0x1038   :  { %v2725_v55 = vpop.permute.xlu1 %2724 }
0x1039   :  { %v2727_v40 = vunpack.i.h.bf16 %v2725_v55  ;;  %v2726_v62 = vunpack.i.l.bf16 %v2725_v55  ;;  %v1563_v63 = vpop.xlane.xlu0 %1562  ;;  %v1079_v55 = vld [vmem:[#allocation2 + $0x178] sm:$0xff] }
0x103a   :  { %2769 = vrcp.f32 %v1563_v63  ;;  %v1082_v63 = vld [vmem:[#allocation2 + $0x190] sm:$0xff] }
0x103b   :  { %v2616_v0 = vpack.c.bf16 %v2727_v40, %v2726_v62  ;;  %v2766_v3 = vpop.eup %2765  ;;  %v2650_v40 = vpack.c.bf16 %v1080_v34, %v1079_v55  ;;  %v1081_v62 = vld [vmem:[#allocation2 + $0x188] sm:$0xff]  ;;  %v1986_v34 = vrot.slane %v2997_v59, %v1059_v42 }
0x103c   :  { %v1281_v8 = vmul.f32 %v2766_v3, %v2758_v47 }
0x103d   :  { %v2730_v2 = vpop.permute.xlu0 %2729  ;;  %2617 = vmatprep.subr.bf16.mxu1 %v2616_v0 }
0x103e   :  { %2619 = vmatpush3.bf16.msra.mxu1 %v2616_v0  ;;  %v2732_v6 = vunpack.i.h.bf16 %v2730_v2  ;;  %v2731_v33 = vunpack.i.l.bf16 %v2730_v2  ;;  %v2654_v0 = vpack.c.bf16 %v1082_v63, %v1081_v62 }
0x103f   :  { %v2768_v4 = vpop.eup %2767  ;;  %2621 = vmatprep.subr.bf16.mxu1 %v2620_v1 }
0x1040   :  { %v1280_v7 = vmul.f32 %v2768_v4, %v2760_v36  ;;  %v2630_v9 = vpack.c.bf16 %v2732_v6, %v2731_v33 }
0x1042   :  { %2451 = vmatprep.mubr.msk.f32.mxu1 %vm248_vm5, %v1280_v7  ;;  %v1774_v7 = vrot.slane %v2997_v59, %v846_v43  ;;  %v1786_v43 = vrot.slane %v2997_v59, %v858_v60 }
0x1043   :  { %2452 = vmatmul.mubr.msk.f32.vlgmr.msra.gmra.mrb[10].mxu1 %vm248_vm5, %v1281_v8 }
0x1044   :  { %2623 = vmatpush3.bf16.msra.mxu1 %v2620_v1  ;;  %v2770_v13 = vpop.eup %2769 }
0x1045   :  { %2631 = vmatprep.subr.bf16.mxu1 %v2630_v9  ;;  %v1569_v31 = vmul.f32 %v2770_v13, %v2762_v38 }
0x1069   :  { %v1566_v10 = vpop.xlane.xlu1 %1565 }
0x106a   :  { %2771 = vrcp.f32 %v1566_v10  ;;  %v1780_v10 = vrot.slane %v2997_v59, %v852_v45 }
0x1074   :  { %v2772_v16 = vpop.eup %2771 }
0x1075   :  { %v1570_v44 = vmul.f32 %v2772_v16, %v2764_v51  ;;  %v1076_v51 = vld [vmem:[#allocation2 + $0x160] sm:$0xff]  ;;  %v1083_v16 = vld [vmem:[#allocation2 + $0x198] sm:$0xff] }
0x1076   :  { %v2642_v52 = vpack.c.bf16 %v1076_v51, %v1075_v50 }
0x1116   :  { %v2453_v14 = vpop.f32.mrb[10].mxu1 }
0x1117   :  { %v1360_v15 = vpop.f32.mrb[11].mxu1 }
0x1118   :  { %2458 = vmatprep.mubr.msk.f32.mxu1 %vm248_vm5, %v1360_v15 }
0x1119   :  { %2459 = vmatmul.mubr.msk.f32.vlgmr.msra.gmra.mrb[12].mxu1 %vm248_vm5, %v2453_v14 }
0x111a   :  { %2633 = vmatpush3.bf16.msra.mxu1 %v2630_v9  ;;  %2472 = vmatprep.mubr.msk.f32.mxu1 %vm248_vm5, %v1569_v31  ;;  %v1084_v31 = vld [vmem:[#allocation2 + $0x1a0] sm:$0xff] }
0x111b   :  { %2635 = vmatprep.subr.bf16.mxu1 %v2634_v30 }
0x111d   :  { %2473 = vmatmul.mubr.msk.f32.vlgmr.msra.gmra.mrb[14].mxu1 %vm248_vm5, %v1570_v44  ;;  %v2658_v44 = vpack.c.bf16 %v1084_v31, %v1083_v16 }
0x111e   :  { %2637 = vmatpush3.bf16.msra.mxu1 %v2634_v30 }
0x111f   :  { %2647 = vmatprep.subr.bf16.mxu1 %v2646_v57 }
0x11f0   :  { %v2474_v17 = vpop.f32.mrb[14].mxu1 }
0x11f1   :  { %v1649_v18 = vpop.f32.mrb[15].mxu1 }
0x11f2   :  { %2479 = vmatprep.mubr.msk.f32.mxu1 %vm248_vm5, %v1649_v18 }
0x11f3   :  { %2480 = vmatmul.mubr.msk.f32.vlgmr.msra.gmra.mrb[12].mxu1 %vm248_vm5, %v2474_v17 }
0x11f4   :  { %2649 = vmatpush3.bf16.msra.mxu1 %v2646_v57 }
0x11f5   :  { %2651 = vmatprep.subr.bf16.mxu1 %v2650_v40 }
0x11f8   :  { %2653 = vmatpush3.bf16.msra.mxu1 %v2650_v40 }
0x11f9   :  { %2655 = vmatprep.subr.bf16.mxu1 %v2654_v0 }
0x11fc   :  { %2657 = vmatpush3.bf16.msra.mxu1 %v2654_v0  ;;  %v1992_v0 = vrot.slane %v2997_v59, %v1065_v48 }
0x11fd   :  { %2659 = vmatprep.subr.bf16.mxu1 %v2658_v44 }
0x1200   :  { %2661 = vmatpush3.bf16.msra.mxu1 %v2658_v44 }
0x12c6   :  { %v2481_v21 = vpop.f32.mrb[12].mxu1 }
0x12c7   :  { %v2673_v22 = vadd.f32 %v2481_v21, %v1455_v20  ;;  %v1732_v23 = vpop.f32.mrb[13].mxu1 }
0x12c8   :  { %v2674_v24 = vadd.f32 %v1732_v23, %v1455_v20  ;;  %v1873_v23 = vrot.slane %v2997_v59, %v945_v5  ;;  %v2218_v59 = vld [vmem:[#allocation2 + $0x1d0] ss:$0 sm:$0xff] }
0x12c9   :  { %v1744_v25 = vadd.f32 %v2673_v22, %v2993_v58 }
0x12ca   :  { %v1743_v26 = vadd.f32 %v2674_v24, %v2989_v56  ;;  %v1073_v56 = vld [vmem:[#allocation2 + $0x148] sm:$0xff] }
0x12cb   :  { %v1748_v27 = vsel %vm160_vm4, %v1744_v25, 0.0  ;;  %v2638_v49 = vpack.c.bf16 %v1074_v41, %v1073_v56  ;;  %v2839_v41 = vmov 0.0|0.0  }
0x12cc   :  { %1749 = vadd.xlane.f32.xlu1 %v1748_v27  ;;  %v1745_v28 = vsel %vm160_vm4, %v1743_v26, 0.0 }
0x12cd   :  { %1746 = vadd.xlane.f32.xlu0 %v1745_v28  ;;  %2639 = vmatprep.subr.bf16.mxu0 %v2638_v49 }
0x12ce   :  { %2641 = vmatpush3.bf16.msra.mxu0 %v2638_v49 }
0x12cf   :  { %2643 = vmatprep.subr.bf16.mxu0 %v2642_v52 }
0x12d2   :  { %2645 = vmatpush3.bf16.msra.mxu0 %v2642_v52 }
0x12d3   :  { %2662 = vmatprep.subr.bf16.mxu0 %v2839_v41 }
0x1359   :  { %v1750_v29 = vpop.xlane.xlu1 %1749 }
0x135a   :  { %v1752_v35 = vmul.f32 0.03125, %v1750_v29  ;;  %v1747_v47 = vpop.xlane.xlu0 %1746 }
0x135b   :  { %v1751_v46 = vmul.f32 0.03125, %v1747_v47 }
0x135c   :  { %v1754_v36 = vsub.f32 %v1744_v25, %v1752_v35 }
0x135d   :  { %v1753_v61 = vsub.f32 %v1743_v26, %v1751_v46 }
0x135e   :  { %v1756_v39 = vmul.f32 %v1754_v36, %v1754_v36 }
0x135f   :  { %v1755_v37 = vmul.f32 %v1753_v61, %v1753_v61 }
0x1360   :  { %v1760_v58 = vsel %vm160_vm4, %v1756_v39, 0.0 }
0x1361   :  { %v1757_v38 = vsel %vm160_vm4, %v1755_v37, 0.0 }
0x1362   :  { %1758 = vadd.xlane.f32.xlu1 %v1757_v38 }
0x1366   :  { %1761 = vadd.xlane.f32.xlu1 %v1760_v58 }
0x13ef   :  { %v1759_v1 = vpop.xlane.xlu1 %1758 }
0x13f0   :  { %v1763_v2 = vmul.f32 0.03125, %v1759_v1 }
0x13f2   :  { %v1765_v3 = vadd.f32 1e-05, %v1763_v2 }
0x13f3   :  { %v1762_v4 = vpop.xlane.xlu1 %1761 }
0x13f4   :  { %2773 = vrsqrt.f32 %v1765_v3  ;;  %v1764_v6 = vmul.f32 0.03125, %v1762_v4  ;;  %v2069_v4 = vld [vmem:[#allocation2 + $0x1b0] sm:$0xff] }
0x13f6   :  { %v1766_v33 = vadd.f32 1e-05, %v1764_v6  ;;  %v2070_v6 = vld [vmem:[#allocation2 + $0x1b8] sm:$0xff] }
0x13f8   :  { %2775 = vrsqrt.f32 %v1766_v33 }
0x13fe   :  { %v2774_v8 = vpop.eup %2773 }
0x13ff   :  { %v1769_v9 = vmul.f32 %v2774_v8, %v1753_v61  ;;  %v2666_v8 = vpack.c.bf16 %v2070_v6, %v2069_v4 }
0x1401   :  { %v1775_v11 = vmul.f32 %v1774_v7, %v1769_v9  ;;  %v2071_v9 = vld [vmem:[#allocation2 + $0x1c0] sm:$0xff] }
0x1402   :  { %v2776_v12 = vpop.eup %2775 }
0x1403   :  { %v1770_v13 = vmul.f32 %v2776_v12, %v1754_v36  ;;  %v1781_v14 = vadd.f32 %v1780_v10, %v1775_v11 }
0x1405   :  { %v1776_v15 = vmul.f32 %v1774_v7, %v1770_v13  ;;  %2490 = vmatprep.mubr.msk.f32.mxu0 %vm160_vm4, %v1781_v14  ;;  %v1995_v7 = vld [vmem:[#allocation2 + $0x58] sm:$0x3] }
0x1407   :  { %v1782_v30 = vadd.f32 %v1780_v10, %v1776_v15  ;;  %v2072_v10 = vld [vmem:[#allocation2 + $0x1c8] sm:$0xff] }
0x1408   :  { %v2669_v42 = vpack.c.bf16 %v2072_v10, %v2071_v9 }
0x1409   :  { %2491 = vmatmul.mubr.msk.f32.vlgmr.msra.gmra.mrb[14].mxu0 %vm160_vm4, %v1782_v30 }
0x140a   :  { %2516 = vmatprep.mubr.msk.f32.mxu0 %vm2840_vm8, %v2833_v19 }
0x14dc   :  { %v2492_v45 = vpop.f32.mrb[14].mxu0 }
0x14dd   :  { %v1865_v17 = vadd.f32 %v2492_v45, %v1786_v43  ;;  %v1859_v18 = vpop.f32.mrb[15].mxu0 }
0x14de   :  { %v1860_v20 = vadd.f32 %v1859_v18, %v1786_v43 }
0x14df   :  { %v1869_v22 = vmax.f32 %v1865_v17, 0.0 }
0x14e0   :  { %v1868_v21 = vmax.f32 %v1860_v20, 0.0 }
0x14e2   :  { %2509 = vmatprep.mubr.msk.f32.mxu1 %vm947_vm7, %v1868_v21 }
0x14e3   :  { %2510 = vmatmul.mubr.msk.f32.vlgmr.msra.gmra.mrb[16].mxu1 %vm947_vm7, %v1869_v22 }
0x15b6   :  { %v2511_v24 = vpop.f32.mrb[16].mxu1 }
0x15b7   :  { %v1946_v25 = vpop.f32.mrb[17].mxu1  ;;  %v1952_v26 = vadd.f32 %v2511_v24, %v1873_v23 }
0x15b8   :  { %v1947_v27 = vadd.f32 %v1946_v25, %v1873_v23 }
0x15b9   :  { %v1956_v29 = vadd.f32 %v1952_v26, %v1782_v30 }
0x15ba   :  { %v1955_v28 = vadd.f32 %v1947_v27, %v1781_v14 }
0x15bb   :  { %v1960_v35 = vsel %vm160_vm4, %v1956_v29, 0.0 }
0x15bc   :  { %v1957_v60 = vsel %vm160_vm4, %v1955_v28, 0.0 }
0x15bd   :  { %1958 = vadd.xlane.f32.xlu1 %v1957_v60 }
0x15c1   :  { %1961 = vadd.xlane.f32.xlu1 %v1960_v35 }
0x164a   :  { %v1959_v47 = vpop.xlane.xlu1 %1958 }
0x164b   :  { %v1963_v46 = vmul.f32 0.03125, %v1959_v47 }
0x164d   :  { %v1965_v36 = vsub.f32 %v1955_v28, %v1963_v46 }
0x164e   :  { %v1962_v61 = vpop.xlane.xlu1 %1961 }
0x164f   :  { %v1964_v37 = vmul.f32 0.03125, %v1962_v61  ;;  %v1967_v38 = vmul.f32 %v1965_v36, %v1965_v36 }
0x1651   :  { %v1966_v39 = vsub.f32 %v1956_v29, %v1964_v37  ;;  %v1969_v5 = vsel %vm160_vm4, %v1967_v38, 0.0 }
0x1652   :  { %1970 = vadd.xlane.f32.xlu0 %v1969_v5 }
0x1653   :  { %v1968_v58 = vmul.f32 %v1966_v39, %v1966_v39 }
0x1655   :  { %v1972_v56 = vsel %vm160_vm4, %v1968_v58, 0.0 }
0x1656   :  { %1973 = vadd.xlane.f32.xlu1 %v1972_v56 }
0x16df   :  { %v1971_v49 = vpop.xlane.xlu0 %1970 }
0x16e0   :  { %v1975_v50 = vmul.f32 0.03125, %v1971_v49 }
0x16e2   :  { %v1977_v51 = vadd.f32 1e-05, %v1975_v50 }
0x16e3   :  { %v1974_v52 = vpop.xlane.xlu1 %1973 }
0x16e4   :  { %2777 = vrsqrt.f32 %v1977_v51  ;;  %v1976_v53 = vmul.f32 0.03125, %v1974_v52 }
0x16e6   :  { %v1978_v54 = vadd.f32 1e-05, %v1976_v53 }
0x16e8   :  { %2779 = vrsqrt.f32 %v1978_v54 }
0x16ee   :  { %v2778_v55 = vpop.eup %2777 }
0x16ef   :  { %v1981_v57 = vmul.f32 %v2778_v55, %v1965_v36 }
0x16f1   :  { %v1987_v63 = vmul.f32 %v1986_v34, %v1981_v57 }
0x16f2   :  { %v2780_v40 = vpop.eup %2779 }
0x16f3   :  { %v1982_v62 = vmul.f32 %v2780_v40, %v1966_v39  ;;  %v1993_v2 = vadd.f32 %v1992_v0, %v1987_v63 }
0x16f5   :  { %v1988_v1 = vmul.f32 %v1986_v34, %v1982_v62 }
0x16f7   :  { %v1994_v3 = vadd.f32 %v1992_v0, %v1988_v1 }
0x16f9   :  { %v2663_v33 = vpack.c.bf16 %v1994_v3, %v1993_v2 }
0x16fb   :  { %2664 = vmatpush3.bf16.msra.mxu0 %v2663_v33 }
0x16fc   :  { %2665 = vmatprep.subr.bf16.mxu0 %v2839_v41 }
0x16fe   :  { %2517 = vmatmul.mubr.msk.f32.vlgmr.msra.gmra.mrb[16].mxu0 %vm248_vm5, %v1995_v7 }
0x16ff   :  { %2667 = vmatpush3.bf16.msra.mxu0 %v2666_v8  ;;  %2527 = vmatprep.mubr.msk.f32.mxu0 %vm2840_vm8, %v2833_v19 }
0x1700   :  { %2668 = vmatprep.subr.bf16.mxu0 %v2839_v41 }
0x1703   :  { %2670 = vmatpush3.bf16.msra.mxu0 %v2669_v42 }
0x17d1   :  { %v2065_v32 = vpop.f32.mrb[16].mxu0 }
0x17d2   :  { %v2518_v48 = vpop.f32.mrb[17].mxu0  ;;  %2528 = vmatmul.mubr.msk.f32.vlgmr.msra.gmra.mrb[18].mxu0 %vm160_vm4, %v2065_v32 }
0x18a5   :  { %v2147_v11 = vpop.f32.mrb[18].mxu0 }
0x18a6   :  { %v2148_v12 = vadd.f32 %v2218_v59, %v2147_v11  ;;  %v2529_v13 = vpop.f32.mrb[19].mxu0 }
0x18a8   :  { %2152 = vst.msk [vmem:[#allocation5] sm:$0x3] %vm2151_vm9, %v2148_v12 }
0x18a9   :  { %2814 = shalt.err (!%p2811_p12)
}
0x18aa   :  { %s2815_s7 = scalar_lea.hbm %s3095_s2, 32 }
0x18ab   :  { %p2816_p13 = scmp.ne.s32.totalorder %s3095_s2, %s2815_s7  ;;  %p2819_p0 = scmp.lt.u32.totalorder %s2815_s7, %s3095_s2 }
0x18ad   :  { %p2821_p1 = pnand %p2819_p0, %p2816_p13 }
0x18af   :  { %2824 = shalt.err (!%p2821_p1)
}
0x18b0   :  { %2162 = dma.vmem_to_hbm [thread:$0]  %s2160_s3, 32, %s3095_s2, [#allocation4]  }
0x18b1   :  { %2827 = dma.done.wait [#allocation4], 32  }
0x18b2   :  { %2828 = vsyncadd [#allocation4], 4294967264 }
0x18b3   :  { %2166 = vsyncpa [#allocation3], 1 }
0x18b4   :  { %2167 = vsyncpa [#allocation4], 1 }

</bundles_post_ra>
